<compile_context>
chip_gen: v6e
topology: v6e:2x2x1
jax: 0.10.0
libtpu: 0.0.40
codegen_flags: <defaults>
</compile_context>

<pallas_src>
import math
import functools

import jax
import jax.numpy as jnp
from jax import lax
from jax.experimental import pallas as pl
from jax.experimental.pallas import tpu as pltpu


# ------------------------------ fused kernel ---------------------------------

def _fused_attn_kernel(x_ref, wqk_ref, bqk_ref, wv_ref, bv_ref, m_ref, bias_ref,
                       wlocal_ref, wlat_ref, bout_ref, o_ref, loc_ref,
                       *, n_head, head_dim, tb):
    """One grid step = `tb` batch elements, full sequence, full width.

    x_ref      : (tb, T, C)    activation tile
    wqk_ref    : (C, 2C)       c_attn q||k weight (pre-transposed, resident)
    bqk_ref    : (1, 2C)       c_attn q||k bias
    wv_ref     : (C, C)        c_attn v weight (pre-transposed, resident)
    bv_ref     : (1, C)        c_attn v bias
    m_ref      : (T, T)        FFT filter, sqrt(softmax scale) folded in (resident)
    bias_ref   : (n_head,T,T)  relative bias (resident)
    wlocal_ref : (C, C)        fuse_local ∘ c_proj   (block-diag fold, resident)
    wlat_ref   : (C, C)        latent_proj ∘ fuse_lat ∘ c_proj (fold, resident)
    bout_ref   : (1, C)        all output biases folded together
    o_ref      : (tb, T, C)    output tile (final (B,T,C) layout, lane-dense)
    loc_ref    : (tb*T, C)     VMEM scratch for per-head PV results
    """
    T = x_ref.shape[1]
    C = n_head * head_dim
    f32 = jnp.float32

    x = x_ref[...].reshape(tb * T, C)                      # collapse batch tile rows

    # ---- c_attn, split into lane-dense q||k and v slabs (one MXU matmul each)
    qk = jnp.dot(x, wqk_ref[...], preferred_element_type=f32) + bqk_ref[...]  # (tb*T, 2C)
    v = jnp.dot(x, wv_ref[...], preferred_element_type=f32) + bv_ref[...]     # (tb*T, C)

    Ms = m_ref[...]                                        # (T, T)

    # ---- per batch element in the tile (tb is small & static -> unrolled)
    for b in range(tb):
        r0 = b * T
        qk_b = qk[r0:r0 + T]                               # (T, 2C) sublane slice
        v_b = v[r0:r0 + T]                                 # (T, C)

        # frequency-domain adaptive scaling of q AND k in ONE matmul
        qk_mod = jnp.dot(Ms, qk_b, preferred_element_type=f32)   # (T, 2C)

        for h in range(n_head):
            lo = h * head_dim
            q_h = qk_mod[:, lo:lo + head_dim]              # (T, hd)
            k_h = qk_mod[:, C + lo:C + lo + head_dim]      # (T, hd)
            v_h = v_b[:, lo:lo + head_dim]                 # (T, hd)

            # softmax scale already folded into Ms; contract head_dim directly
            # (no explicit k.T -> no XLU transpose per head)
            s = lax.dot_general(q_h, k_h, (((1,), (1,)), ((), ())),
                                preferred_element_type=f32) + bias_ref[h]
            s = s - jnp.max(s, axis=-1, keepdims=True)
            p = jnp.exp(s)
            denom = jnp.sum(p, axis=-1, keepdims=True)
            r = pl.reciprocal(denom, approx=True)          # EUP slot
            r = r * (2.0 - denom * r)                      # one Newton step -> f32 accurate
            # attn_dropout: identity (eval)
            loc_ref[r0:r0 + T, lo:lo + head_dim] = jnp.dot(
                p * r, v_h, preferred_element_type=f32)    # PV into scratch lane-slice

    local = loc_ref[...]                                   # (tb*T, C) lane-dense

    # ---- latent path: per-batch mean over T of v, weights fully pre-folded
    v_mean = jnp.mean(v.reshape(tb, T, C), axis=1)         # (tb, C)
    lat = jnp.dot(v_mean, wlat_ref[...], preferred_element_type=f32)   # (tb, C)

    # ---- fuse_layer + c_proj folded into one matmul + bias; resid_dropout = id
    out = jnp.dot(local, wlocal_ref[...], preferred_element_type=f32) + bout_ref[...]
    o_ref[...] = out.reshape(tb, T, C) + lat[:, None, :]   # lane-dense final layout


def _pick_tb(B, T):
    """Largest divisor of B keeping the per-step row tile modest (<=1024 rows)."""
    best = 1
    for d in range(1, B + 1):
        if B % d == 0 and d * T <= 1024:
            best = d
    return best


def freq_domain_latent_self_attention(x, p, n_head):
    """Full module forward in a single fused pallas_call over the batch grid."""
    B, T, C = x.shape
    hd = C // n_head
    assert p["M_scaled"].shape == (T, T), "prepare_params must be built for this T"
    tb = _pick_tb(B, T)

    kernel = functools.partial(_fused_attn_kernel,
                               n_head=n_head, head_dim=hd, tb=tb)

    return pl.pallas_call(
        kernel,
        out_shape=jax.ShapeDtypeStruct((B, T, C), jnp.float32),
        grid=(B // tb,),
        in_specs=[
            pl.BlockSpec((tb, T, C), lambda i: (i, 0, 0)),        # activation tile
            pl.BlockSpec((C, 2 * C), lambda i: (0, 0)),           # W_qk^T   (resident)
            pl.BlockSpec((1, 2 * C), lambda i: (0, 0)),           # b_qk     (resident)
            pl.BlockSpec((C, C), lambda i: (0, 0)),               # W_v^T    (resident)
            pl.BlockSpec((1, C), lambda i: (0, 0)),               # b_v      (resident)
            pl.BlockSpec((T, T), lambda i: (0, 0)),               # M filter (resident)
            pl.BlockSpec((n_head, T, T), lambda i: (0, 0, 0)),    # rel_bias (resident)
            pl.BlockSpec((C, C), lambda i: (0, 0)),               # fuse_local∘proj
            pl.BlockSpec((C, C), lambda i: (0, 0)),               # lat∘fuse_lat∘proj
            pl.BlockSpec((1, C), lambda i: (0, 0)),               # folded bias
        ],
        out_specs=pl.BlockSpec((tb, T, C), lambda i: (i, 0, 0)),
        scratch_shapes=[pltpu.VMEM((tb * T, C), jnp.float32)],    # per-head PV scratch
        compiler_params=pltpu.CompilerParams(
            dimension_semantics=("parallel",),
            vmem_limit_bytes=48 * 1024 * 1024),                   # v7x-safe headroom
    )(x, p["w_qk_t"], p["b_qk"], p["w_v_t"], p["b_v"],
      p["M_scaled"], p["rel_bias_T"],
      p["w_local_out"], p["w_lat_out"], p["b_out"])


# ------------------------------ parameter prep -------------------------------

def prepare_params(params, n_head, seq_len):
    """One-time prep, memoized on (seq_len, alpha):
       * pre-transpose / split c_attn into q||k and v projections
       * build the (T,T) FFT-filter linear map with sqrt(softmax scale) folded in
       * fold latent_proj / fuse_layer / c_proj into block-diagonal (C,C) maps
    """
    C = params["w_attn"].shape[1]
    hd = C // n_head
    scale = 1.0 / math.sqrt(hd)
    eye_h = jnp.eye(n_head, dtype=jnp.float32)
    T = seq_len

    # TODO(synk): rfft/irfft has no Pallas primitive; the real-scaled FFT
    # filtering along T is an exact linear map, folded into this (T,T) matrix.
    freqs = jnp.fft.rfftfreq(T, d=1.0)
    scaling = jnp.exp(-jnp.abs(freqs) * T * params["alpha"])          # (T//2+1,)
    eye_t = jnp.eye(T, dtype=jnp.float32)
    M = jnp.fft.irfft(jnp.fft.rfft(eye_t, axis=0) * scaling[:, None], n=T, axis=0)
    # fold sqrt(softmax scale): (Ms q)(Ms k)^T == scale * (Mq)(Mk)^T
    M_scaled = (M * math.sqrt(scale)).astype(jnp.float32)

    w_proj_t = params["w_proj"].T                                     # (C, C)
    wf_local_bd = jnp.kron(eye_h, params["w_fuse"][:, :hd].T)         # (C, C)
    wf_lat_bd = jnp.kron(eye_h, params["w_fuse"][:, hd:].T)           # (C, C)
    w_lat_bd = jnp.kron(eye_h, params["w_lat"].T)                     # (C, C)
    b_lat_t = jnp.tile(params["b_lat"], n_head).reshape(1, C)
    b_fuse_t = jnp.tile(params["b_fuse"], n_head).reshape(1, C)

    # exact linear composition: fuse_layer (+ latent_proj) ∘ c_proj
    w_local_out = wf_local_bd @ w_proj_t                              # (C, C)
    w_lat_out = w_lat_bd @ wf_lat_bd @ w_proj_t                       # (C, C)
    b_out = (b_lat_t @ wf_lat_bd @ w_proj_t + b_fuse_t @ w_proj_t
             + params["b_proj"].reshape(1, C))                        # (1, C)

    return {
        "w_qk_t": params["w_attn"][:2 * C, :].T,                      # (C, 2C)
        "b_qk": params["b_attn"][:2 * C].reshape(1, 2 * C),
        "w_v_t": params["w_attn"][2 * C:, :].T,                       # (C, C)
        "b_v": params["b_attn"][2 * C:].reshape(1, C),
        "M_scaled": M_scaled,
        "rel_bias_T": params["rel_bias"][:, :T, :T],
        "w_local_out": w_local_out,
        "w_lat_out": w_lat_out,
        "b_out": b_out,
    }


# ------------------------------ reference (jnp) -------------------------------

def reference_forward(x, params, n_head):
    B, T, C = x.shape
    hd = C // n_head
    scale = 1.0 / math.sqrt(hd)

    qkv = x @ params["w_attn"].T + params["b_attn"]
    q, k, v = jnp.split(qkv, 3, axis=2)
    sh = lambda t: t.reshape(B, T, n_head, hd).transpose(0, 2, 1, 3)
    q, k, v = sh(q), sh(k), sh(v)

    freqs = jnp.fft.rfftfreq(T, d=1.0)
    s = jnp.exp(-jnp.abs(freqs) * T * params["alpha"]).reshape(1, 1, -1, 1)
    q_mod = jnp.fft.irfft(jnp.fft.rfft(q, axis=2) * s, n=T, axis=2)
    k_mod = jnp.fft.irfft(jnp.fft.rfft(k, axis=2) * s, n=T, axis=2)

    att = (q_mod @ jnp.swapaxes(k_mod, -1, -2)) * scale
    att = att + params["rel_bias"][:, :T, :T][None]
    att = jax.nn.softmax(att, axis=-1)
    local = att @ v

    latent = v.mean(axis=2) @ params["w_lat"].T + params["b_lat"]     # (B, nh, hd)
    lat_exp = jnp.broadcast_to(latent[:, :, None, :], local.shape)
    fused = (jnp.concatenate([local, lat_exp], axis=-1) @ params["w_fuse"].T
             + params["b_fuse"])
    fused = fused.transpose(0, 2, 1, 3).reshape(B, T, C)
    return fused @ params["w_proj"].T + params["b_proj"]


# ---------------------------------- main --------------------------------------

if __name__ == "__main__":
    # config: n_embd=32, n_head=4, block_size=8 -> head_dim=8
    B, T, C, n_head = 2, 8, 32, 4
    hd = C // n_head
    block_size = T

    key = jax.random.PRNGKey(0)
    keys = jax.random.split(key, 12)

    def uni(k, shape, fan_in):
        bound = 1.0 / math.sqrt(fan_in)
        return jax.random.uniform(k, shape, jnp.float32, -bound, bound)

    params = {
        "w_attn": uni(keys[0], (3 * C, C), C),
        "b_attn": uni(keys[1], (3 * C,), C),
        "w_proj": uni(keys[2], (C, C), C),
        "b_proj": uni(keys[3], (C,), C),
        # learnable parameter; use nonzero values so the per-head bias path is tested
        "rel_bias": 0.1 * jax.random.normal(keys[9], (n_head, block_size, block_size),
                                            jnp.float32),
        "alpha": jnp.float32(1.0),
        "w_lat": uni(keys[4], (hd, hd), hd),
        "b_lat": uni(keys[5], (hd,), hd),
        "w_fuse": uni(keys[6], (hd, 2 * hd), 2 * hd),
        "b_fuse": uni(keys[7], (hd,), 2 * hd),
    }

    x = jax.random.normal(keys[8], (B, T, C), jnp.float32)

    prepped = prepare_params(params, n_head, seq_len=T)     # one-time weight/filter prep
    fwd = jax.jit(functools.partial(freq_domain_latent_self_attention,
                                    n_head=n_head))

    out = jax.block_until_ready(fwd(x, prepped))
    ref = jax.block_until_ready(reference_forward(x, params, n_head))

    assert out.shape == (B, T, C)
    err = float(jnp.max(jnp.abs(out - ref)))
    assert jnp.allclose(out, ref, atol=1e-3, rtol=1e-3), f"max err = {err}"
    print("KERNEL_OK")
</pallas_src>

<mosaic_0001>
module attributes {stable_mosaic.version = 11 : i64} {
  func.func @_fused_attn_kernel(%arg0: i32, %arg1: memref<2x8x32xf32, #tpu.memory_space<vmem>>, %arg2: memref<32x64xf32, #tpu.memory_space<vmem>>, %arg3: memref<1x64xf32, #tpu.memory_space<vmem>>, %arg4: memref<32x32xf32, #tpu.memory_space<vmem>>, %arg5: memref<1x32xf32, #tpu.memory_space<vmem>>, %arg6: memref<8x8xf32, #tpu.memory_space<vmem>>, %arg7: memref<4x8x8xf32, #tpu.memory_space<vmem>>, %arg8: memref<32x32xf32, #tpu.memory_space<vmem>>, %arg9: memref<32x32xf32, #tpu.memory_space<vmem>>, %arg10: memref<1x32xf32, #tpu.memory_space<vmem>>, %arg11: memref<2x8x32xf32, #tpu.memory_space<vmem>>, %arg12: memref<16x32xf32, #tpu.memory_space<vmem>>) attributes {dimension_semantics = [#tpu.dimension_semantics<parallel>], iteration_bounds = array<i64: 1>, scalar_prefetch = 0 : i64, scratch_operands = 1 : i64, tpu.core_type = #tpu.core_type<tc>, window_params = [{transform_indices = @transform_0, window_bounds = array<i64: 2, 8, 32>}, {pipeline_mode = #tpu.pipeline_mode<synchronous>, transform_indices = @transform_1, window_bounds = array<i64: 32, 64>}, {pipeline_mode = #tpu.pipeline_mode<synchronous>, transform_indices = @transform_2, window_bounds = array<i64: 1, 64>}, {pipeline_mode = #tpu.pipeline_mode<synchronous>, transform_indices = @transform_3, window_bounds = array<i64: 32, 32>}, {pipeline_mode = #tpu.pipeline_mode<synchronous>, transform_indices = @transform_4, window_bounds = array<i64: 1, 32>}, {pipeline_mode = #tpu.pipeline_mode<synchronous>, transform_indices = @transform_5, window_bounds = array<i64: 8, 8>}, {pipeline_mode = #tpu.pipeline_mode<synchronous>, transform_indices = @transform_6, window_bounds = array<i64: 4, 8, 8>}, {pipeline_mode = #tpu.pipeline_mode<synchronous>, transform_indices = @transform_7, window_bounds = array<i64: 32, 32>}, {pipeline_mode = #tpu.pipeline_mode<synchronous>, transform_indices = @transform_8, window_bounds = array<i64: 32, 32>}, {pipeline_mode = #tpu.pipeline_mode<synchronous>, transform_indices = @transform_9, window_bounds = array<i64: 1, 32>}, {transform_indices = @transform_10, window_bounds = array<i64: 2, 8, 32>}]} {
    %c0 = arith.constant 0 : index
    %c0_0 = arith.constant 0 : index
    %c0_1 = arith.constant 0 : index
    %0 = vector.load %arg1[%c0, %c0_0, %c0_1] : memref<2x8x32xf32, #tpu.memory_space<vmem>>, vector<2x8x32xf32>
    %1 = vector.shape_cast %0 : vector<2x8x32xf32> to vector<16x32xf32>
    %c0_2 = arith.constant 0 : index
    %c0_3 = arith.constant 0 : index
    %2 = vector.load %arg2[%c0_2, %c0_3] : memref<32x64xf32, #tpu.memory_space<vmem>>, vector<32x64xf32>
    %cst = arith.constant dense<0.000000e+00> : vector<16x64xf32>
    %3 = tpu.matmul %1, %2, %cst {dimension_numbers = #tpu.dot_dimension_numbers<[1], [0], [0], [1], [0, 0, 1, 1], [], []>} : vector<16x32xf32>, vector<32x64xf32>, vector<16x64xf32> -> vector<16x64xf32>
    %c0_4 = arith.constant 0 : index
    %c0_5 = arith.constant 0 : index
    %4 = vector.load %arg3[%c0_4, %c0_5] : memref<1x64xf32, #tpu.memory_space<vmem>>, vector<1x64xf32>
    %5 = vector.broadcast %4 : vector<1x64xf32> to vector<16x64xf32>
    %6 = arith.addf %3, %5 : vector<16x64xf32>
    %c0_6 = arith.constant 0 : index
    %c0_7 = arith.constant 0 : index
    %7 = vector.load %arg4[%c0_6, %c0_7] : memref<32x32xf32, #tpu.memory_space<vmem>>, vector<32x32xf32>
    %cst_8 = arith.constant dense<0.000000e+00> : vector<16x32xf32>
    %8 = tpu.matmul %1, %7, %cst_8 {dimension_numbers = #tpu.dot_dimension_numbers<[1], [0], [0], [1], [0, 0, 1, 1], [], []>} : vector<16x32xf32>, vector<32x32xf32>, vector<16x32xf32> -> vector<16x32xf32>
    %c0_9 = arith.constant 0 : index
    %c0_10 = arith.constant 0 : index
    %9 = vector.load %arg5[%c0_9, %c0_10] : memref<1x32xf32, #tpu.memory_space<vmem>>, vector<1x32xf32>
    %10 = vector.broadcast %9 : vector<1x32xf32> to vector<16x32xf32>
    %11 = arith.addf %8, %10 : vector<16x32xf32>
    %c0_11 = arith.constant 0 : index
    %c0_12 = arith.constant 0 : index
    %12 = vector.load %arg6[%c0_11, %c0_12] : memref<8x8xf32, #tpu.memory_space<vmem>>, vector<8x8xf32>
    %13 = vector.extract_strided_slice %6 {offsets = [0, 0], sizes = [8, 64], strides = [1, 1]} : vector<16x64xf32> to vector<8x64xf32>
    %14 = vector.extract_strided_slice %11 {offsets = [0, 0], sizes = [8, 32], strides = [1, 1]} : vector<16x32xf32> to vector<8x32xf32>
    %cst_13 = arith.constant dense<0.000000e+00> : vector<8x64xf32>
    %15 = tpu.matmul %12, %13, %cst_13 {dimension_numbers = #tpu.dot_dimension_numbers<[1], [0], [0], [1], [0, 0, 1, 1], [], []>} : vector<8x8xf32>, vector<8x64xf32>, vector<8x64xf32> -> vector<8x64xf32>
    %16 = vector.extract_strided_slice %15 {offsets = [0, 0], sizes = [8, 8], strides = [1, 1]} : vector<8x64xf32> to vector<8x8xf32>
    %17 = vector.extract_strided_slice %15 {offsets = [0, 32], sizes = [8, 8], strides = [1, 1]} : vector<8x64xf32> to vector<8x8xf32>
    %18 = vector.extract_strided_slice %14 {offsets = [0, 0], sizes = [8, 8], strides = [1, 1]} : vector<8x32xf32> to vector<8x8xf32>
    %cst_14 = arith.constant dense<0.000000e+00> : vector<8x8xf32>
    %19 = tpu.matmul %16, %17, %cst_14 {dimension_numbers = #tpu.dot_dimension_numbers<[1], [1], [0], [0], [0, 0, 1, 0], [], []>} : vector<8x8xf32>, vector<8x8xf32>, vector<8x8xf32> -> vector<8x8xf32>
    %c0_15 = arith.constant 0 : index
    %c0_16 = arith.constant 0 : index
    %c0_17 = arith.constant 0 : index
    %20 = vector.load %arg7[%c0_15, %c0_16, %c0_17] : memref<4x8x8xf32, #tpu.memory_space<vmem>>, vector<1x8x8xf32>
    %21 = vector.shape_cast %20 : vector<1x8x8xf32> to vector<8x8xf32>
    %22 = arith.addf %19, %21 : vector<8x8xf32>
    %cst_18 = arith.constant dense<0xFF800000> : vector<8xf32>
    %23 = vector.multi_reduction <maximumf>, %22, %cst_18 [1] : vector<8x8xf32> to vector<8xf32>
    %24 = vector.shape_cast %23 : vector<8xf32> to vector<8x1xf32>
    %25 = vector.broadcast %24 : vector<8x1xf32> to vector<8x8xf32>
    %26 = arith.subf %22, %25 : vector<8x8xf32>
    %27 = math.exp %26 : vector<8x8xf32>
    %cst_19 = arith.constant dense<0.000000e+00> : vector<8xf32>
    %28 = vector.multi_reduction <add>, %27, %cst_19 [1] : vector<8x8xf32> to vector<8xf32>
    %29 = vector.shape_cast %28 : vector<8xf32> to vector<8x1xf32>
    %30 = tpu.reciprocal %29 {approx = true} : vector<8x1xf32> -> vector<8x1xf32>
    %31 = arith.mulf %29, %30 : vector<8x1xf32>
    %cst_20 = arith.constant 2.000000e+00 : f32
    %32 = vector.broadcast %cst_20 : f32 to vector<8x1xf32>
    %33 = arith.subf %32, %31 : vector<8x1xf32>
    %34 = arith.mulf %30, %33 : vector<8x1xf32>
    %35 = vector.broadcast %34 : vector<8x1xf32> to vector<8x8xf32>
    %36 = arith.mulf %27, %35 : vector<8x8xf32>
    %cst_21 = arith.constant dense<0.000000e+00> : vector<8x8xf32>
    %37 = tpu.matmul %36, %18, %cst_21 {dimension_numbers = #tpu.dot_dimension_numbers<[1], [0], [0], [1], [0, 0, 1, 1], [], []>} : vector<8x8xf32>, vector<8x8xf32>, vector<8x8xf32> -> vector<8x8xf32>
    %c0_22 = arith.constant 0 : index
    %c0_23 = arith.constant 0 : index
    %38 = vector.load %arg12[%c0_22, %c0_23] : memref<16x32xf32, #tpu.memory_space<vmem>>, vector<8x8xf32>
    tpu.vector_store %arg12[%c0_22, %c0_23], %37 {strides = array<i32>} : memref<16x32xf32, #tpu.memory_space<vmem>>, vector<8x8xf32>,
    %39 = vector.extract_strided_slice %15 {offsets = [0, 8], sizes = [8, 8], strides = [1, 1]} : vector<8x64xf32> to vector<8x8xf32>
    %40 = vector.extract_strided_slice %15 {offsets = [0, 40], sizes = [8, 8], strides = [1, 1]} : vector<8x64xf32> to vector<8x8xf32>
    %41 = vector.extract_strided_slice %14 {offsets = [0, 8], sizes = [8, 8], strides = [1, 1]} : vector<8x32xf32> to vector<8x8xf32>
    %cst_24 = arith.constant dense<0.000000e+00> : vector<8x8xf32>
    %42 = tpu.matmul %39, %40, %cst_24 {dimension_numbers = #tpu.dot_dimension_numbers<[1], [1], [0], [0], [0, 0, 1, 0], [], []>} : vector<8x8xf32>, vector<8x8xf32>, vector<8x8xf32> -> vector<8x8xf32>
    %c1 = arith.constant 1 : index
    %c0_25 = arith.constant 0 : index
    %c0_26 = arith.constant 0 : index
    %43 = vector.load %arg7[%c1, %c0_25, %c0_26] : memref<4x8x8xf32, #tpu.memory_space<vmem>>, vector<1x8x8xf32>
    %44 = vector.shape_cast %43 : vector<1x8x8xf32> to vector<8x8xf32>
    %45 = arith.addf %42, %44 : vector<8x8xf32>
    %cst_27 = arith.constant dense<0xFF800000> : vector<8xf32>
    %46 = vector.multi_reduction <maximumf>, %45, %cst_27 [1] : vector<8x8xf32> to vector<8xf32>
    %47 = vector.shape_cast %46 : vector<8xf32> to vector<8x1xf32>
    %48 = vector.broadcast %47 : vector<8x1xf32> to vector<8x8xf32>
    %49 = arith.subf %45, %48 : vector<8x8xf32>
    %50 = math.exp %49 : vector<8x8xf32>
    %cst_28 = arith.constant dense<0.000000e+00> : vector<8xf32>
    %51 = vector.multi_reduction <add>, %50, %cst_28 [1] : vector<8x8xf32> to vector<8xf32>
    %52 = vector.shape_cast %51 : vector<8xf32> to vector<8x1xf32>
    %53 = tpu.reciprocal %52 {approx = true} : vector<8x1xf32> -> vector<8x1xf32>
    %54 = arith.mulf %52, %53 : vector<8x1xf32>
    %cst_29 = arith.constant 2.000000e+00 : f32
    %55 = vector.broadcast %cst_29 : f32 to vector<8x1xf32>
    %56 = arith.subf %55, %54 : vector<8x1xf32>
    %57 = arith.mulf %53, %56 : vector<8x1xf32>
    %58 = vector.broadcast %57 : vector<8x1xf32> to vector<8x8xf32>
    %59 = arith.mulf %50, %58 : vector<8x8xf32>
    %cst_30 = arith.constant dense<0.000000e+00> : vector<8x8xf32>
    %60 = tpu.matmul %59, %41, %cst_30 {dimension_numbers = #tpu.dot_dimension_numbers<[1], [0], [0], [1], [0, 0, 1, 1], [], []>} : vector<8x8xf32>, vector<8x8xf32>, vector<8x8xf32> -> vector<8x8xf32>
    %c0_31 = arith.constant 0 : index
    %c8 = arith.constant 8 : index
    %61 = vector.load %arg12[%c0_31, %c8] : memref<16x32xf32, #tpu.memory_space<vmem>>, vector<8x8xf32>
    tpu.vector_store %arg12[%c0_31, %c8], %60 {strides = array<i32>} : memref<16x32xf32, #tpu.memory_space<vmem>>, vector<8x8xf32>,
    %62 = vector.extract_strided_slice %15 {offsets = [0, 16], sizes = [8, 8], strides = [1, 1]} : vector<8x64xf32> to vector<8x8xf32>
    %63 = vector.extract_strided_slice %15 {offsets = [0, 48], sizes = [8, 8], strides = [1, 1]} : vector<8x64xf32> to vector<8x8xf32>
    %64 = vector.extract_strided_slice %14 {offsets = [0, 16], sizes = [8, 8], strides = [1, 1]} : vector<8x32xf32> to vector<8x8xf32>
    %cst_32 = arith.constant dense<0.000000e+00> : vector<8x8xf32>
    %65 = tpu.matmul %62, %63, %cst_32 {dimension_numbers = #tpu.dot_dimension_numbers<[1], [1], [0], [0], [0, 0, 1, 0], [], []>} : vector<8x8xf32>, vector<8x8xf32>, vector<8x8xf32> -> vector<8x8xf32>
    %c2 = arith.constant 2 : index
    %c0_33 = arith.constant 0 : index
    %c0_34 = arith.constant 0 : index
    %66 = vector.load %arg7[%c2, %c0_33, %c0_34] : memref<4x8x8xf32, #tpu.memory_space<vmem>>, vector<1x8x8xf32>
    %67 = vector.shape_cast %66 : vector<1x8x8xf32> to vector<8x8xf32>
    %68 = arith.addf %65, %67 : vector<8x8xf32>
    %cst_35 = arith.constant dense<0xFF800000> : vector<8xf32>
    %69 = vector.multi_reduction <maximumf>, %68, %cst_35 [1] : vector<8x8xf32> to vector<8xf32>
    %70 = vector.shape_cast %69 : vector<8xf32> to vector<8x1xf32>
    %71 = vector.broadcast %70 : vector<8x1xf32> to vector<8x8xf32>
    %72 = arith.subf %68, %71 : vector<8x8xf32>
    %73 = math.exp %72 : vector<8x8xf32>
    %cst_36 = arith.constant dense<0.000000e+00> : vector<8xf32>
    %74 = vector.multi_reduction <add>, %73, %cst_36 [1] : vector<8x8xf32> to vector<8xf32>
    %75 = vector.shape_cast %74 : vector<8xf32> to vector<8x1xf32>
    %76 = tpu.reciprocal %75 {approx = true} : vector<8x1xf32> -> vector<8x1xf32>
    %77 = arith.mulf %75, %76 : vector<8x1xf32>
    %cst_37 = arith.constant 2.000000e+00 : f32
    %78 = vector.broadcast %cst_37 : f32 to vector<8x1xf32>
    %79 = arith.subf %78, %77 : vector<8x1xf32>
    %80 = arith.mulf %76, %79 : vector<8x1xf32>
    %81 = vector.broadcast %80 : vector<8x1xf32> to vector<8x8xf32>
    %82 = arith.mulf %73, %81 : vector<8x8xf32>
    %cst_38 = arith.constant dense<0.000000e+00> : vector<8x8xf32>
    %83 = tpu.matmul %82, %64, %cst_38 {dimension_numbers = #tpu.dot_dimension_numbers<[1], [0], [0], [1], [0, 0, 1, 1], [], []>} : vector<8x8xf32>, vector<8x8xf32>, vector<8x8xf32> -> vector<8x8xf32>
    %c0_39 = arith.constant 0 : index
    %c16 = arith.constant 16 : index
    %84 = vector.load %arg12[%c0_39, %c16] : memref<16x32xf32, #tpu.memory_space<vmem>>, vector<8x8xf32>
    tpu.vector_store %arg12[%c0_39, %c16], %83 {strides = array<i32>} : memref<16x32xf32, #tpu.memory_space<vmem>>, vector<8x8xf32>,
    %85 = vector.extract_strided_slice %15 {offsets = [0, 24], sizes = [8, 8], strides = [1, 1]} : vector<8x64xf32> to vector<8x8xf32>
    %86 = vector.extract_strided_slice %15 {offsets = [0, 56], sizes = [8, 8], strides = [1, 1]} : vector<8x64xf32> to vector<8x8xf32>
    %87 = vector.extract_strided_slice %14 {offsets = [0, 24], sizes = [8, 8], strides = [1, 1]} : vector<8x32xf32> to vector<8x8xf32>
    %cst_40 = arith.constant dense<0.000000e+00> : vector<8x8xf32>
    %88 = tpu.matmul %85, %86, %cst_40 {dimension_numbers = #tpu.dot_dimension_numbers<[1], [1], [0], [0], [0, 0, 1, 0], [], []>} : vector<8x8xf32>, vector<8x8xf32>, vector<8x8xf32> -> vector<8x8xf32>
    %c3 = arith.constant 3 : index
    %c0_41 = arith.constant 0 : index
    %c0_42 = arith.constant 0 : index
    %89 = vector.load %arg7[%c3, %c0_41, %c0_42] : memref<4x8x8xf32, #tpu.memory_space<vmem>>, vector<1x8x8xf32>
    %90 = vector.shape_cast %89 : vector<1x8x8xf32> to vector<8x8xf32>
    %91 = arith.addf %88, %90 : vector<8x8xf32>
    %cst_43 = arith.constant dense<0xFF800000> : vector<8xf32>
    %92 = vector.multi_reduction <maximumf>, %91, %cst_43 [1] : vector<8x8xf32> to vector<8xf32>
    %93 = vector.shape_cast %92 : vector<8xf32> to vector<8x1xf32>
    %94 = vector.broadcast %93 : vector<8x1xf32> to vector<8x8xf32>
    %95 = arith.subf %91, %94 : vector<8x8xf32>
    %96 = math.exp %95 : vector<8x8xf32>
    %cst_44 = arith.constant dense<0.000000e+00> : vector<8xf32>
    %97 = vector.multi_reduction <add>, %96, %cst_44 [1] : vector<8x8xf32> to vector<8xf32>
    %98 = vector.shape_cast %97 : vector<8xf32> to vector<8x1xf32>
    %99 = tpu.reciprocal %98 {approx = true} : vector<8x1xf32> -> vector<8x1xf32>
    %100 = arith.mulf %98, %99 : vector<8x1xf32>
    %cst_45 = arith.constant 2.000000e+00 : f32
    %101 = vector.broadcast %cst_45 : f32 to vector<8x1xf32>
    %102 = arith.subf %101, %100 : vector<8x1xf32>
    %103 = arith.mulf %99, %102 : vector<8x1xf32>
    %104 = vector.broadcast %103 : vector<8x1xf32> to vector<8x8xf32>
    %105 = arith.mulf %96, %104 : vector<8x8xf32>
    %cst_46 = arith.constant dense<0.000000e+00> : vector<8x8xf32>
    %106 = tpu.matmul %105, %87, %cst_46 {dimension_numbers = #tpu.dot_dimension_numbers<[1], [0], [0], [1], [0, 0, 1, 1], [], []>} : vector<8x8xf32>, vector<8x8xf32>, vector<8x8xf32> -> vector<8x8xf32>
    %c0_47 = arith.constant 0 : index
    %c24 = arith.constant 24 : index
    %107 = vector.load %arg12[%c0_47, %c24] : memref<16x32xf32, #tpu.memory_space<vmem>>, vector<8x8xf32>
    tpu.vector_store %arg12[%c0_47, %c24], %106 {strides = array<i32>} : memref<16x32xf32, #tpu.memory_space<vmem>>, vector<8x8xf32>,
    %108 = vector.extract_strided_slice %6 {offsets = [8, 0], sizes = [8, 64], strides = [1, 1]} : vector<16x64xf32> to vector<8x64xf32>
    %109 = vector.extract_strided_slice %11 {offsets = [8, 0], sizes = [8, 32], strides = [1, 1]} : vector<16x32xf32> to vector<8x32xf32>
    %cst_48 = arith.constant dense<0.000000e+00> : vector<8x64xf32>
    %110 = tpu.matmul %12, %108, %cst_48 {dimension_numbers = #tpu.dot_dimension_numbers<[1], [0], [0], [1], [0, 0, 1, 1], [], []>} : vector<8x8xf32>, vector<8x64xf32>, vector<8x64xf32> -> vector<8x64xf32>
    %111 = vector.extract_strided_slice %110 {offsets = [0, 0], sizes = [8, 8], strides = [1, 1]} : vector<8x64xf32> to vector<8x8xf32>
    %112 = vector.extract_strided_slice %110 {offsets = [0, 32], sizes = [8, 8], strides = [1, 1]} : vector<8x64xf32> to vector<8x8xf32>
    %113 = vector.extract_strided_slice %109 {offsets = [0, 0], sizes = [8, 8], strides = [1, 1]} : vector<8x32xf32> to vector<8x8xf32>
    %cst_49 = arith.constant dense<0.000000e+00> : vector<8x8xf32>
    %114 = tpu.matmul %111, %112, %cst_49 {dimension_numbers = #tpu.dot_dimension_numbers<[1], [1], [0], [0], [0, 0, 1, 0], [], []>} : vector<8x8xf32>, vector<8x8xf32>, vector<8x8xf32> -> vector<8x8xf32>
    %c0_50 = arith.constant 0 : index
    %c0_51 = arith.constant 0 : index
    %c0_52 = arith.constant 0 : index
    %115 = vector.load %arg7[%c0_50, %c0_51, %c0_52] : memref<4x8x8xf32, #tpu.memory_space<vmem>>, vector<1x8x8xf32>
    %116 = vector.shape_cast %115 : vector<1x8x8xf32> to vector<8x8xf32>
    %117 = arith.addf %114, %116 : vector<8x8xf32>
    %cst_53 = arith.constant dense<0xFF800000> : vector<8xf32>
    %118 = vector.multi_reduction <maximumf>, %117, %cst_53 [1] : vector<8x8xf32> to vector<8xf32>
    %119 = vector.shape_cast %118 : vector<8xf32> to vector<8x1xf32>
    %120 = vector.broadcast %119 : vector<8x1xf32> to vector<8x8xf32>
    %121 = arith.subf %117, %120 : vector<8x8xf32>
    %122 = math.exp %121 : vector<8x8xf32>
    %cst_54 = arith.constant dense<0.000000e+00> : vector<8xf32>
    %123 = vector.multi_reduction <add>, %122, %cst_54 [1] : vector<8x8xf32> to vector<8xf32>
    %124 = vector.shape_cast %123 : vector<8xf32> to vector<8x1xf32>
    %125 = tpu.reciprocal %124 {approx = true} : vector<8x1xf32> -> vector<8x1xf32>
    %126 = arith.mulf %124, %125 : vector<8x1xf32>
    %cst_55 = arith.constant 2.000000e+00 : f32
    %127 = vector.broadcast %cst_55 : f32 to vector<8x1xf32>
    %128 = arith.subf %127, %126 : vector<8x1xf32>
    %129 = arith.mulf %125, %128 : vector<8x1xf32>
    %130 = vector.broadcast %129 : vector<8x1xf32> to vector<8x8xf32>
    %131 = arith.mulf %122, %130 : vector<8x8xf32>
    %cst_56 = arith.constant dense<0.000000e+00> : vector<8x8xf32>
    %132 = tpu.matmul %131, %113, %cst_56 {dimension_numbers = #tpu.dot_dimension_numbers<[1], [0], [0], [1], [0, 0, 1, 1], [], []>} : vector<8x8xf32>, vector<8x8xf32>, vector<8x8xf32> -> vector<8x8xf32>
    %c8_57 = arith.constant 8 : index
    %c0_58 = arith.constant 0 : index
    %133 = vector.load %arg12[%c8_57, %c0_58] : memref<16x32xf32, #tpu.memory_space<vmem>>, vector<8x8xf32>
    tpu.vector_store %arg12[%c8_57, %c0_58], %132 {strides = array<i32>} : memref<16x32xf32, #tpu.memory_space<vmem>>, vector<8x8xf32>,
    %134 = vector.extract_strided_slice %110 {offsets = [0, 8], sizes = [8, 8], strides = [1, 1]} : vector<8x64xf32> to vector<8x8xf32>
    %135 = vector.extract_strided_slice %110 {offsets = [0, 40], sizes = [8, 8], strides = [1, 1]} : vector<8x64xf32> to vector<8x8xf32>
    %136 = vector.extract_strided_slice %109 {offsets = [0, 8], sizes = [8, 8], strides = [1, 1]} : vector<8x32xf32> to vector<8x8xf32>
    %cst_59 = arith.constant dense<0.000000e+00> : vector<8x8xf32>
    %137 = tpu.matmul %134, %135, %cst_59 {dimension_numbers = #tpu.dot_dimension_numbers<[1], [1], [0], [0], [0, 0, 1, 0], [], []>} : vector<8x8xf32>, vector<8x8xf32>, vector<8x8xf32> -> vector<8x8xf32>
    %c1_60 = arith.constant 1 : index
    %c0_61 = arith.constant 0 : index
    %c0_62 = arith.constant 0 : index
    %138 = vector.load %arg7[%c1_60, %c0_61, %c0_62] : memref<4x8x8xf32, #tpu.memory_space<vmem>>, vector<1x8x8xf32>
    %139 = vector.shape_cast %138 : vector<1x8x8xf32> to vector<8x8xf32>
    %140 = arith.addf %137, %139 : vector<8x8xf32>
    %cst_63 = arith.constant dense<0xFF800000> : vector<8xf32>
    %141 = vector.multi_reduction <maximumf>, %140, %cst_63 [1] : vector<8x8xf32> to vector<8xf32>
    %142 = vector.shape_cast %141 : vector<8xf32> to vector<8x1xf32>
    %143 = vector.broadcast %142 : vector<8x1xf32> to vector<8x8xf32>
    %144 = arith.subf %140, %143 : vector<8x8xf32>
    %145 = math.exp %144 : vector<8x8xf32>
    %cst_64 = arith.constant dense<0.000000e+00> : vector<8xf32>
    %146 = vector.multi_reduction <add>, %145, %cst_64 [1] : vector<8x8xf32> to vector<8xf32>
    %147 = vector.shape_cast %146 : vector<8xf32> to vector<8x1xf32>
    %148 = tpu.reciprocal %147 {approx = true} : vector<8x1xf32> -> vector<8x1xf32>
    %149 = arith.mulf %147, %148 : vector<8x1xf32>
    %cst_65 = arith.constant 2.000000e+00 : f32
    %150 = vector.broadcast %cst_65 : f32 to vector<8x1xf32>
    %151 = arith.subf %150, %149 : vector<8x1xf32>
    %152 = arith.mulf %148, %151 : vector<8x1xf32>
    %153 = vector.broadcast %152 : vector<8x1xf32> to vector<8x8xf32>
    %154 = arith.mulf %145, %153 : vector<8x8xf32>
    %cst_66 = arith.constant dense<0.000000e+00> : vector<8x8xf32>
    %155 = tpu.matmul %154, %136, %cst_66 {dimension_numbers = #tpu.dot_dimension_numbers<[1], [0], [0], [1], [0, 0, 1, 1], [], []>} : vector<8x8xf32>, vector<8x8xf32>, vector<8x8xf32> -> vector<8x8xf32>
    %c8_67 = arith.constant 8 : index
    %c8_68 = arith.constant 8 : index
    %156 = vector.load %arg12[%c8_67, %c8_68] : memref<16x32xf32, #tpu.memory_space<vmem>>, vector<8x8xf32>
    tpu.vector_store %arg12[%c8_67, %c8_68], %155 {strides = array<i32>} : memref<16x32xf32, #tpu.memory_space<vmem>>, vector<8x8xf32>,
    %157 = vector.extract_strided_slice %110 {offsets = [0, 16], sizes = [8, 8], strides = [1, 1]} : vector<8x64xf32> to vector<8x8xf32>
    %158 = vector.extract_strided_slice %110 {offsets = [0, 48], sizes = [8, 8], strides = [1, 1]} : vector<8x64xf32> to vector<8x8xf32>
    %159 = vector.extract_strided_slice %109 {offsets = [0, 16], sizes = [8, 8], strides = [1, 1]} : vector<8x32xf32> to vector<8x8xf32>
    %cst_69 = arith.constant dense<0.000000e+00> : vector<8x8xf32>
    %160 = tpu.matmul %157, %158, %cst_69 {dimension_numbers = #tpu.dot_dimension_numbers<[1], [1], [0], [0], [0, 0, 1, 0], [], []>} : vector<8x8xf32>, vector<8x8xf32>, vector<8x8xf32> -> vector<8x8xf32>
    %c2_70 = arith.constant 2 : index
    %c0_71 = arith.constant 0 : index
    %c0_72 = arith.constant 0 : index
    %161 = vector.load %arg7[%c2_70, %c0_71, %c0_72] : memref<4x8x8xf32, #tpu.memory_space<vmem>>, vector<1x8x8xf32>
    %162 = vector.shape_cast %161 : vector<1x8x8xf32> to vector<8x8xf32>
    %163 = arith.addf %160, %162 : vector<8x8xf32>
    %cst_73 = arith.constant dense<0xFF800000> : vector<8xf32>
    %164 = vector.multi_reduction <maximumf>, %163, %cst_73 [1] : vector<8x8xf32> to vector<8xf32>
    %165 = vector.shape_cast %164 : vector<8xf32> to vector<8x1xf32>
    %166 = vector.broadcast %165 : vector<8x1xf32> to vector<8x8xf32>
    %167 = arith.subf %163, %166 : vector<8x8xf32>
    %168 = math.exp %167 : vector<8x8xf32>
    %cst_74 = arith.constant dense<0.000000e+00> : vector<8xf32>
    %169 = vector.multi_reduction <add>, %168, %cst_74 [1] : vector<8x8xf32> to vector<8xf32>
    %170 = vector.shape_cast %169 : vector<8xf32> to vector<8x1xf32>
    %171 = tpu.reciprocal %170 {approx = true} : vector<8x1xf32> -> vector<8x1xf32>
    %172 = arith.mulf %170, %171 : vector<8x1xf32>
    %cst_75 = arith.constant 2.000000e+00 : f32
    %173 = vector.broadcast %cst_75 : f32 to vector<8x1xf32>
    %174 = arith.subf %173, %172 : vector<8x1xf32>
    %175 = arith.mulf %171, %174 : vector<8x1xf32>
    %176 = vector.broadcast %175 : vector<8x1xf32> to vector<8x8xf32>
    %177 = arith.mulf %168, %176 : vector<8x8xf32>
    %cst_76 = arith.constant dense<0.000000e+00> : vector<8x8xf32>
    %178 = tpu.matmul %177, %159, %cst_76 {dimension_numbers = #tpu.dot_dimension_numbers<[1], [0], [0], [1], [0, 0, 1, 1], [], []>} : vector<8x8xf32>, vector<8x8xf32>, vector<8x8xf32> -> vector<8x8xf32>
    %c8_77 = arith.constant 8 : index
    %c16_78 = arith.constant 16 : index
    %179 = vector.load %arg12[%c8_77, %c16_78] : memref<16x32xf32, #tpu.memory_space<vmem>>, vector<8x8xf32>
    tpu.vector_store %arg12[%c8_77, %c16_78], %178 {strides = array<i32>} : memref<16x32xf32, #tpu.memory_space<vmem>>, vector<8x8xf32>,
    %180 = vector.extract_strided_slice %110 {offsets = [0, 24], sizes = [8, 8], strides = [1, 1]} : vector<8x64xf32> to vector<8x8xf32>
    %181 = vector.extract_strided_slice %110 {offsets = [0, 56], sizes = [8, 8], strides = [1, 1]} : vector<8x64xf32> to vector<8x8xf32>
    %182 = vector.extract_strided_slice %109 {offsets = [0, 24], sizes = [8, 8], strides = [1, 1]} : vector<8x32xf32> to vector<8x8xf32>
    %cst_79 = arith.constant dense<0.000000e+00> : vector<8x8xf32>
    %183 = tpu.matmul %180, %181, %cst_79 {dimension_numbers = #tpu.dot_dimension_numbers<[1], [1], [0], [0], [0, 0, 1, 0], [], []>} : vector<8x8xf32>, vector<8x8xf32>, vector<8x8xf32> -> vector<8x8xf32>
    %c3_80 = arith.constant 3 : index
    %c0_81 = arith.constant 0 : index
    %c0_82 = arith.constant 0 : index
    %184 = vector.load %arg7[%c3_80, %c0_81, %c0_82] : memref<4x8x8xf32, #tpu.memory_space<vmem>>, vector<1x8x8xf32>
    %185 = vector.shape_cast %184 : vector<1x8x8xf32> to vector<8x8xf32>
    %186 = arith.addf %183, %185 : vector<8x8xf32>
    %cst_83 = arith.constant dense<0xFF800000> : vector<8xf32>
    %187 = vector.multi_reduction <maximumf>, %186, %cst_83 [1] : vector<8x8xf32> to vector<8xf32>
    %188 = vector.shape_cast %187 : vector<8xf32> to vector<8x1xf32>
    %189 = vector.broadcast %188 : vector<8x1xf32> to vector<8x8xf32>
    %190 = arith.subf %186, %189 : vector<8x8xf32>
    %191 = math.exp %190 : vector<8x8xf32>
    %cst_84 = arith.constant dense<0.000000e+00> : vector<8xf32>
    %192 = vector.multi_reduction <add>, %191, %cst_84 [1] : vector<8x8xf32> to vector<8xf32>
    %193 = vector.shape_cast %192 : vector<8xf32> to vector<8x1xf32>
    %194 = tpu.reciprocal %193 {approx = true} : vector<8x1xf32> -> vector<8x1xf32>
    %195 = arith.mulf %193, %194 : vector<8x1xf32>
    %cst_85 = arith.constant 2.000000e+00 : f32
    %196 = vector.broadcast %cst_85 : f32 to vector<8x1xf32>
    %197 = arith.subf %196, %195 : vector<8x1xf32>
    %198 = arith.mulf %194, %197 : vector<8x1xf32>
    %199 = vector.broadcast %198 : vector<8x1xf32> to vector<8x8xf32>
    %200 = arith.mulf %191, %199 : vector<8x8xf32>
    %cst_86 = arith.constant dense<0.000000e+00> : vector<8x8xf32>
    %201 = tpu.matmul %200, %182, %cst_86 {dimension_numbers = #tpu.dot_dimension_numbers<[1], [0], [0], [1], [0, 0, 1, 1], [], []>} : vector<8x8xf32>, vector<8x8xf32>, vector<8x8xf32> -> vector<8x8xf32>
    %c8_87 = arith.constant 8 : index
    %c24_88 = arith.constant 24 : index
    %202 = vector.load %arg12[%c8_87, %c24_88] : memref<16x32xf32, #tpu.memory_space<vmem>>, vector<8x8xf32>
    tpu.vector_store %arg12[%c8_87, %c24_88], %201 {strides = array<i32>} : memref<16x32xf32, #tpu.memory_space<vmem>>, vector<8x8xf32>,
    %c0_89 = arith.constant 0 : index
    %c0_90 = arith.constant 0 : index
    %203 = vector.load %arg12[%c0_89, %c0_90] : memref<16x32xf32, #tpu.memory_space<vmem>>, vector<16x32xf32>
    %204 = vector.shape_cast %11 : vector<16x32xf32> to vector<2x8x32xf32>
    %cst_91 = arith.constant dense<0.000000e+00> : vector<2x32xf32>
    %205 = vector.multi_reduction <add>, %204, %cst_91 [1] : vector<2x8x32xf32> to vector<2x32xf32>
    %cst_92 = arith.constant 8.000000e+00 : f32
    %206 = vector.broadcast %cst_92 : f32 to vector<2x32xf32>
    %207 = arith.divf %205, %206 : vector<2x32xf32>
    %c0_93 = arith.constant 0 : index
    %c0_94 = arith.constant 0 : index
    %208 = vector.load %arg9[%c0_93, %c0_94] : memref<32x32xf32, #tpu.memory_space<vmem>>, vector<32x32xf32>
    %cst_95 = arith.constant dense<0.000000e+00> : vector<2x32xf32>
    %209 = tpu.matmul %207, %208, %cst_95 {dimension_numbers = #tpu.dot_dimension_numbers<[1], [0], [0], [1], [0, 0, 1, 1], [], []>} : vector<2x32xf32>, vector<32x32xf32>, vector<2x32xf32> -> vector<2x32xf32>
    %c0_96 = arith.constant 0 : index
    %c0_97 = arith.constant 0 : index
    %210 = vector.load %arg8[%c0_96, %c0_97] : memref<32x32xf32, #tpu.memory_space<vmem>>, vector<32x32xf32>
    %cst_98 = arith.constant dense<0.000000e+00> : vector<16x32xf32>
    %211 = tpu.matmul %203, %210, %cst_98 {dimension_numbers = #tpu.dot_dimension_numbers<[1], [0], [0], [1], [0, 0, 1, 1], [], []>} : vector<16x32xf32>, vector<32x32xf32>, vector<16x32xf32> -> vector<16x32xf32>
    %c0_99 = arith.constant 0 : index
    %c0_100 = arith.constant 0 : index
    %212 = vector.load %arg10[%c0_99, %c0_100] : memref<1x32xf32, #tpu.memory_space<vmem>>, vector<1x32xf32>
    %213 = vector.broadcast %212 : vector<1x32xf32> to vector<16x32xf32>
    %214 = arith.addf %211, %213 : vector<16x32xf32>
    %215 = vector.shape_cast %214 : vector<16x32xf32> to vector<2x8x32xf32>
    %216 = vector.shape_cast %209 : vector<2x32xf32> to vector<2x1x32xf32>
    %217 = vector.broadcast %216 : vector<2x1x32xf32> to vector<2x8x32xf32>
    %218 = arith.addf %215, %217 : vector<2x8x32xf32>
    %c0_101 = arith.constant 0 : index
    %c0_102 = arith.constant 0 : index
    %c0_103 = arith.constant 0 : index
    %219 = vector.load %arg11[%c0_101, %c0_102, %c0_103] : memref<2x8x32xf32, #tpu.memory_space<vmem>>, vector<2x8x32xf32>
    tpu.vector_store %arg11[%c0_101, %c0_102, %c0_103], %218 {strides = array<i32>} : memref<2x8x32xf32, #tpu.memory_space<vmem>>, vector<2x8x32xf32>,
    return
  }
  func.func @transform_0(%arg0: i32) -> (i32, i32, i32) {
    %c0_i32 = arith.constant 0 : i32
    %c0_i32_0 = arith.constant 0 : i32
    %c0_i32_1 = arith.constant 0 : i32
    return %arg0, %c0_i32, %c0_i32_0 : i32, i32, i32
  }
  func.func @transform_1(%arg0: i32) -> (i32, i32) {
    %c0_i32 = arith.constant 0 : i32
    %c0_i32_0 = arith.constant 0 : i32
    %c0_i32_1 = arith.constant 0 : i32
    return %c0_i32, %c0_i32_0 : i32, i32
  }
  func.func @transform_2(%arg0: i32) -> (i32, i32) {
    %c0_i32 = arith.constant 0 : i32
    %c0_i32_0 = arith.constant 0 : i32
    %c0_i32_1 = arith.constant 0 : i32
    return %c0_i32, %c0_i32_0 : i32, i32
  }
  func.func @transform_3(%arg0: i32) -> (i32, i32) {
    %c0_i32 = arith.constant 0 : i32
    %c0_i32_0 = arith.constant 0 : i32
    %c0_i32_1 = arith.constant 0 : i32
    return %c0_i32, %c0_i32_0 : i32, i32
  }
  func.func @transform_4(%arg0: i32) -> (i32, i32) {
    %c0_i32 = arith.constant 0 : i32
    %c0_i32_0 = arith.constant 0 : i32
    %c0_i32_1 = arith.constant 0 : i32
    return %c0_i32, %c0_i32_0 : i32, i32
  }
  func.func @transform_5(%arg0: i32) -> (i32, i32) {
    %c0_i32 = arith.constant 0 : i32
    %c0_i32_0 = arith.constant 0 : i32
    %c0_i32_1 = arith.constant 0 : i32
    return %c0_i32, %c0_i32_0 : i32, i32
  }
  func.func @transform_6(%arg0: i32) -> (i32, i32, i32) {
    %c0_i32 = arith.constant 0 : i32
    %c0_i32_0 = arith.constant 0 : i32
    %c0_i32_1 = arith.constant 0 : i32
    %c0_i32_2 = arith.constant 0 : i32
    return %c0_i32, %c0_i32_0, %c0_i32_1 : i32, i32, i32
  }
  func.func @transform_7(%arg0: i32) -> (i32, i32) {
    %c0_i32 = arith.constant 0 : i32
    %c0_i32_0 = arith.constant 0 : i32
    %c0_i32_1 = arith.constant 0 : i32
    return %c0_i32, %c0_i32_0 : i32, i32
  }
  func.func @transform_8(%arg0: i32) -> (i32, i32) {
    %c0_i32 = arith.constant 0 : i32
    %c0_i32_0 = arith.constant 0 : i32
    %c0_i32_1 = arith.constant 0 : i32
    return %c0_i32, %c0_i32_0 : i32, i32
  }
  func.func @transform_9(%arg0: i32) -> (i32, i32) {
    %c0_i32 = arith.constant 0 : i32
    %c0_i32_0 = arith.constant 0 : i32
    %c0_i32_1 = arith.constant 0 : i32
    return %c0_i32, %c0_i32_0 : i32, i32
  }
  func.func @transform_10(%arg0: i32) -> (i32, i32, i32) {
    %c0_i32 = arith.constant 0 : i32
    %c0_i32_0 = arith.constant 0 : i32
    %c0_i32_1 = arith.constant 0 : i32
    return %arg0, %c0_i32, %c0_i32_0 : i32, i32, i32
  }
}

</mosaic_0001>

<bundles_post_ra>
// kernel: freq_domain_latent_self_attention.1
= control target key start
LH: loop header
LB: loop body
LE: loop exit
PB: predicated region body
PF: predicated region fallthrough
CT: control target
= control target key end

     0   :  { %15 = vsyncpa [#allocation4], 0  ;;  %s2868_s0 = inlined_call_operand.hbm [shape: f32[2,8,32], index: 0, kind: input, shape index: {}]   ;;  %s2869_s1 = inlined_call_operand.hbm [shape: f32[32,64], index: 1, kind: input, shape index: {}]   ;;  %s2870_s2 = inlined_call_operand.vmem [shape: f32[1,64], index: 2, kind: input, shape index: {}]   ;;  %s2871_s3 = inlined_call_operand.hbm [shape: f32[32,32], index: 3, kind: input, shape index: {}]   ;;  %s2872_s4 = inlined_call_operand.vmem [shape: f32[1,32], index: 4, kind: input, shape index: {}]   ;;  %s2873_s5 = inlined_call_operand.hbm [shape: f32[8,8], index: 5, kind: input, shape index: {}]   ;;  %s2874_s6 = inlined_call_operand.hbm [shape: f32[4,8,8], index: 6, kind: input, shape index: {}]   ;;  %s2875_s7 = inlined_call_operand.hbm [shape: f32[32,32], index: 7, kind: input, shape index: {}]   ;;  %s2876_s8 = inlined_call_operand.hbm [shape: f32[32,32], index: 8, kind: input, shape index: {}]   ;;  %s2877_s9 = inlined_call_operand.vmem [shape: f32[1,32], index: 9, kind: input, shape index: {}]   ;;  %s2878_s10 = inlined_call_operand.hbm [shape: f32[2,8,32], index: 10, kind: output, shape index: {}]  }
   0x1   :  { %16 = vsyncpa [#allocation7], 0 }
   0x2   :  { %17 = vsyncpa [#allocation10], 0 }
   0x3   :  { %18 = vsyncpa [#allocation13], 0 }
   0x4   :  { %19 = vsyncpa [#allocation5], 0  ;;  %s2540_s13 = smov [#allocation6]   ;;  %s2541_s15 = smov [#allocation9]  }
   0x5   :  { %s37_s14 = sshll.u32 %s2540_s13, 4  ;;  %s66_s16 = sshll.u32 %s2541_s15, 4  ;;  %s38_s14 = int_to_ptr.vmem [resolvable:$true] %s37_s14  ;;  %s67_s16 = int_to_ptr.vmem [resolvable:$true] %s66_s16 }
   0x6   :  { %s2378_s17 = scalar_lea.vmem %s38_s14, 512  ;;  %p2383_p1 = scmp.lt.s32.totalorder %s38_s14, %s38_s14 }
   0x7   :  { %p2379_p0 = scmp.ne.s32.totalorder %s38_s14, %s2378_s17  ;;  %p2384_p2 = scmp.lt.s32.totalorder %s2378_s17, %s2378_s17 }
   0x9   :  { %p2385_p3 = por %p2384_p2, %p2383_p1 }
   0xb   :  { %p2386_p4 = pnand %p2385_p3, %p2379_p0 }
   0xd   :  { %2389 = shalt.err (!%p2386_p4)
}
   0xe   :  { %s2542_s18 = smov 128   ;;  %s2543_s19 = smov 8  }
   0xf   :  { %43 = dma.hbm_to_vmem [thread:$0]  %s2869_s1, 512, %s38_s14, [#allocation7], %s2542_s18, %s2542_s18, %s2543_s19  }
  0x10   :  { %s2398_s22 = scalar_lea.vmem %s67_s16, 128  ;;  %p2403_p6 = scmp.lt.s32.totalorder %s67_s16, %s67_s16 }
  0x11   :  { %p2399_p5 = scmp.ne.s32.totalorder %s67_s16, %s2398_s22  ;;  %p2404_p7 = scmp.lt.s32.totalorder %s2398_s22, %s2398_s22 }
  0x13   :  { %p2405_p8 = por %p2404_p7, %p2403_p6 }
  0x15   :  { %p2406_p9 = pnand %p2405_p8, %p2399_p5 }
  0x17   :  { %2409 = shalt.err (!%p2406_p9)
}
  0x18   :  { %69 = dma.hbm_to_vmem [thread:$0]  %s2873_s5, 128, %s67_s16, [#allocation10]  }
  0x19   :  { %s2544_s25 = smov [#allocation12]   ;;  %s2545_s27 = smov [#allocation3]  }
  0x1a   :  { %s87_s26 = sshll.u32 %s2544_s25, 4  ;;  %s25_s28 = sshll.u32 %s2545_s27, 4  ;;  %s88_s26 = int_to_ptr.vmem [resolvable:$true] %s87_s26  ;;  %s26_s28 = int_to_ptr.vmem [resolvable:$true] %s25_s28 }
  0x1b   :  { %s2418_s29 = scalar_lea.vmem %s88_s26, 512  ;;  %p2423_p11 = scmp.lt.s32.totalorder %s88_s26, %s88_s26 }
  0x1c   :  { %p2419_p10 = scmp.ne.s32.totalorder %s88_s26, %s2418_s29  ;;  %p2424_p12 = scmp.lt.s32.totalorder %s2418_s29, %s2418_s29 }
  0x1e   :  { %p2425_p13 = por %p2424_p12, %p2423_p11 }
  0x20   :  { %p2426_p0 = pnand %p2425_p13, %p2419_p10 }
  0x22   :  { %2429 = shalt.err (!%p2426_p0)
}
  0x23   :  { %93 = dma.hbm_to_vmem [thread:$0]  %s2875_s7, 512, %s88_s26, [#allocation13], %s2542_s18, %s2542_s18, %s2543_s19  }
  0x24   :  { %s2438_s5 = scalar_lea.vmem %s26_s28, 256  ;;  %p2443_p2 = scmp.lt.s32.totalorder %s26_s28, %s26_s28 }
  0x25   :  { %p2439_p1 = scmp.ne.s32.totalorder %s26_s28, %s2438_s5  ;;  %p2444_p3 = scmp.lt.s32.totalorder %s2438_s5, %s2438_s5 }
  0x27   :  { %p2445_p4 = por %p2444_p3, %p2443_p2 }
  0x29   :  { %p2446_p5 = pnand %p2445_p4, %p2439_p1 }
  0x2b   :  { %2449 = shalt.err (!%p2446_p5)
}
  0x2c   :  { %31 = dma.hbm_to_vmem [thread:$0]  %s2868_s0, 256, %s26_s28, [#allocation4], %s2542_s18, %s2542_s18, %s2543_s19  }
  0x2d   :  { %s2546_s13 = smov [#allocation8]   ;;  %s2547_s15 = smov [#allocation11]  }
  0x2e   :  { %s51_s14 = sshll.u32 %s2546_s13, 4  ;;  %s75_s16 = sshll.u32 %s2547_s15, 4  ;;  %s52_s14 = int_to_ptr.vmem [resolvable:$true] %s51_s14  ;;  %s76_s16 = int_to_ptr.vmem [resolvable:$true] %s75_s16 }
  0x2f   :  { %s2458_s7 = scalar_lea.vmem %s52_s14, 512  ;;  %p2463_p7 = scmp.lt.s32.totalorder %s52_s14, %s52_s14 }
  0x30   :  { %p2459_p6 = scmp.ne.s32.totalorder %s52_s14, %s2458_s7  ;;  %p2464_p8 = scmp.lt.s32.totalorder %s2458_s7, %s2458_s7 }
  0x32   :  { %p2465_p9 = por %p2464_p8, %p2463_p7 }
  0x34   :  { %p2466_p10 = pnand %p2465_p9, %p2459_p6 }
  0x36   :  { %2469 = shalt.err (!%p2466_p10)
}
  0x37   :  { %57 = dma.hbm_to_vmem [thread:$0]  %s2871_s3, 512, %s52_s14, [#allocation7], %s2542_s18, %s2542_s18, %s2543_s19  }
  0x38   :  { %s2478_s0 = scalar_lea.vmem %s76_s16, 512  ;;  %p2483_p12 = scmp.lt.s32.totalorder %s76_s16, %s76_s16 }
  0x39   :  { %p2479_p11 = scmp.ne.s32.totalorder %s76_s16, %s2478_s0  ;;  %p2484_p13 = scmp.lt.s32.totalorder %s2478_s0, %s2478_s0 }
  0x3b   :  { %p2485_p0 = por %p2484_p13, %p2483_p12 }
  0x3d   :  { %p2486_p1 = pnand %p2485_p0, %p2479_p11 }
  0x3f   :  { %2489 = shalt.err (!%p2486_p1)
}
  0x40   :  { %81 = dma.hbm_to_vmem [thread:$0]  %s2874_s6, 512, %s76_s16, [#allocation10], %s2542_s18, %s2542_s18, %s2543_s19  }
  0x41   :  { %s2548_s23 = smov [#allocation14]  }
  0x42   :  { %s99_s24 = sshll.u32 %s2548_s23, 4  ;;  %s100_s24 = int_to_ptr.vmem [resolvable:$true] %s99_s24 }
  0x43   :  { %s2498_s25 = scalar_lea.vmem %s100_s24, 512  ;;  %p2503_p3 = scmp.lt.s32.totalorder %s100_s24, %s100_s24 }
  0x44   :  { %p2499_p2 = scmp.ne.s32.totalorder %s100_s24, %s2498_s25  ;;  %p2504_p4 = scmp.lt.s32.totalorder %s2498_s25, %s2498_s25 }
  0x46   :  { %p2505_p5 = por %p2504_p4, %p2503_p3 }
  0x48   :  { %p2506_p6 = pnand %p2505_p5, %p2499_p2 }
  0x4a   :  { %2509 = shalt.err (!%p2506_p6)
}
  0x4b   :  { %105 = dma.hbm_to_vmem [thread:$0]  %s2876_s8, 512, %s100_s24, [#allocation13], %s2542_s18, %s2542_s18, %s2543_s19  }
  0x4c   :  { %2530 = dma.done.wait [#allocation4], 256  }
  0x4d   :  { %2531 = vsyncadd [#allocation4], 4294967040 }
  0x4e   :  { %2532 = dma.done.wait [#allocation7], 1024  }
  0x4f   :  { %2533 = vsyncadd [#allocation7], 4294966272 }
  0x50   :  { %2534 = dma.done.wait [#allocation10], 640  }
  0x51   :  { %2535 = vsyncadd [#allocation10], 4294966656 }
  0x52   :  { %2536 = dma.done.wait [#allocation13], 1024  }
  0x53   :  { %2537 = vsyncadd [#allocation13], 4294966272  ;;  %vm142_vm0 = vcmask 261120   ;;  %v134_v0 = vld [vmem:[#allocation6 + $0x18] sm:$0xff]  ;;  %v133_v1 = vld [vmem:[#allocation6 + $0x10] sm:$0xff]  ;;  %v2549_v6 = vmov 0.0  }
  0x54   :  { %2182 = vmatprep.subr.mxu0 %v134_v0  ;;  %v129_v2 = vld [vmem:[#allocation3] sm:$0xff]  ;;  %v132_v3 = vld [vmem:[#allocation6 + $0x8] sm:$0xff]  ;;  %v131_v4 = vld [vmem:[#allocation6] sm:$0xff]  ;;  %vm2550_vm1 = vmmov 0   ;;  %vm311_vm2 = vcmask 64512   ;;  %s2552_s27 = smov 96  }
  0x55   :  { %2183 = vmatpush3.msra.mxu0 %v134_v0  ;;  %2190 = vmatprep.mubr.msk.f32.mxu0 %vm142_vm0, %v129_v2  ;;  %v130_v5 = vld [vmem:[#allocation3 + $0x8] sm:$0xff]  ;;  %v2087_v7 = vld [vmem:[%s2870_s2] ss:$0 sm:$0xff]  ;;  %v226_v14 = vld [vmem:[#allocation8 + $0x10] sm:$0xff]  ;;  %s2551_s2 = smov 120   ;;  %s2553_s28 = smov 80  }
  0x56   :  { %2184 = vmatprep.subr.mxu0 %v133_v1  ;;  %2201 = vmatprep.mubr.msk.f32.mxu1 %vm142_vm0, %v129_v2  ;;  %v2667_v12 = vld [vmem:[#allocation9] sm:$0xff]  ;;  %v227_v13 = vld [vmem:[#allocation8 + $0x18] sm:$0xff]  ;;  %v225_v15 = vld [vmem:[#allocation8 + $0x8] sm:$0xff]  ;;  %s2554_s29 = smov 88   ;;  %s2555_s1 = smov 72   ;;  %vm1864_vm3 = vcmask 1041409  }
  0x57   :  { %2185 = vmatpush3.msra.mxu0 %v133_v1  ;;  %2193 = vmatprep.subr.mxu1 %v227_v13  ;;  %v224_v16 = vld [vmem:[#allocation8] sm:$0xff]  ;;  %s2556_s30 = smov 112   ;;  %s2557_s5 = smov 104   ;;  %v2722_v31 = vld [vmem:[#allocation11] sm:$0xff]  ;;  %v2725_v35 = vld [vmem:[#allocation11 + $0x8] sm:$0xff]  ;;  %vm726_vm4 = vcmask 130112  }
  0x58   :  { %2186 = vmatprep.subr.mxu0 %v132_v3  ;;  %2194 = vmatpush3.msra.mxu1 %v227_v13  ;;  %v2090_v20 = vld [vmem:[%s2872_s4] ss:$0 sm:$0xff]  ;;  %v2729_v40 = vld [vmem:[#allocation11 + $0x10] sm:$0xff]  ;;  %s2558_s4 = smov 16   ;;  %s2559_s13 = smov 24   ;;  %vm902_vm5 = vcmask 195712  }
  0x59   :  { %2187 = vmatpush3.msra.mxu0 %v132_v3  ;;  %2195 = vmatprep.subr.mxu1 %v226_v14  ;;  %v2733_v45 = vld [vmem:[#allocation11 + $0x18] sm:$0xff]  ;;  %vm1078_vm6 = vcmask 261312   ;;  %s2561_s16 = smov [#allocation15]  }
  0x5a   :  { %2188 = vmatprep.subr.mxu0 %v131_v4  ;;  %2196 = vmatpush3.msra.mxu1 %v226_v14  ;;  %s2072_s7 = sshll.u32 %s2561_s16, 4  ;;  %s2073_s7 = int_to_ptr.vmem [resolvable:$true] %s2072_s7 }
  0x5b   :  { %2189 = vmatpush3.msra.mxu0 %v131_v4  ;;  %2197 = vmatprep.subr.mxu1 %v225_v15  ;;  %s2510_s17 = scalar_lea.vmem %s2073_s7, 256  ;;  %p2515_p8 = scmp.lt.s32.totalorder %s2073_s7, %s2073_s7 }
  0x5c   :  { %2191 = vmatmul.mubr.msk.f32.vlgmr.msra.gmra.mxu0 %vm142_vm0, %v130_v5  ;;  %2204 = vmatprep.subr.mxu0 %v2549_v6  ;;  %p2511_p7 = scmp.ne.s32.totalorder %s2073_s7, %s2510_s17  ;;  %p2516_p9 = scmp.lt.s32.totalorder %s2510_s17, %s2510_s17 }
  0x5d   :  { %2206 = vmatprep.mubr.msk.f32.mxu0 %vm2550_vm1, %v2549_v6  ;;  %2198 = vmatpush3.msra.mxu1 %v225_v15 }
  0x5e   :  { %2199 = vmatprep.subr.mxu1 %v224_v16  ;;  %p2517_p10 = por %p2516_p9, %p2515_p8 }
  0x5f   :  { %2200 = vmatpush3.msra.mxu1 %v224_v16 }
  0x60   :  { %2202 = vmatmul.mubr.msk.f32.vlgmr.msra.gmra.mxu1 %vm142_vm0, %v130_v5  ;;  %2209 = vmatprep.subr.mxu1 %v2549_v6  ;;  %p2518_p11 = pnand %p2517_p10, %p2511_p7 }
  0x61   :  { %2211 = vmatprep.mubr.msk.f32.mxu1 %vm2550_vm1, %v2549_v6 }
 0x11c   :  { %v2192_v8 = vpop.f32.mrf.mxu0 }
 0x11d   :  { %v2665_v9 = vadd.f32 %v2192_v8, %v2087_v7 }
 0x11e   :  { %v215_v10 = vpop.f32.mrf.mxu0 }
 0x11f   :  { %v216_v11 = vadd.f32 %v2087_v7, %v215_v10 }
 0x120   :  { %v2203_v19 = vpop.f32.mrf.mxu1 }
 0x121   :  { %2205 = vmatpush3.msra.mxu0 %v216_v11  ;;  %v2714_v30 = vadd.f32 %v2203_v19, %v2090_v20 }
 0x122   :  { %2207 = vmatmul.mubr.msk.f32.vlgmr.msra.gmra.mxu0 %vm311_vm2, %v2667_v12  ;;  %2214 = vmatprep.subr.mxu0 %v2549_v6  ;;  %v301_v21 = vpop.f32.mrf.mxu1 }
 0x123   :  { %2216 = vmatprep.mubr.msk.f32.mxu0 %vm2550_vm1, %v2549_v6  ;;  %v2688_v22 = vadd.f32 %v2090_v20, %v301_v21 }
 0x125   :  { %2215 = vmatpush3.msra.mxu0 %v2688_v22 }
 0x126   :  { %2224 = vmatprep.subr.mxu0 %v2549_v6 }
 0x1e2   :  { %v381_v17 = vpop.f32.mrf.mxu0 }
 0x1e3   :  { %553 = vrot.lane.b32.xlu1 %v381_v17, %s2551_s2  ;;  %387 = vrot.lane.b32.xlu0 %v381_v17, %s2552_s27 }
 0x1e4   :  { %v2208_v18 = vpop.f32.mrf.mxu0 }
 0x1e7   :  { %732 = vrot.lane.b32.xlu1 %v381_v17, %s2553_s28  ;;  %555 = vrot.lane.b32.xlu0 %v381_v17, %s2554_s29 }
 0x1eb   :  { %908 = vrot.lane.b32.xlu1 %v381_v17, %s2555_s1  ;;  %730 = vrot.lane.b32.xlu0 %v381_v17, %s2556_s30 }
 0x1ef   :  { %906 = vrot.lane.b32.xlu0 %v381_v17, %s2557_s5 }
 0x255   :  { %v554_v23 = vpop.permute.xlu1 %553  ;;  %v388_v24 = vpop.permute.xlu0 %387 }
 0x256   :  { %2210 = vmatpush3.xpose.msk.msra.mxu1 %vm311_vm2, %v388_v24 }
 0x257   :  { %2219 = vmatprep.subr.mxu1 %v2549_v6 }
 0x259   :  { %2212 = vmatmul.mubr.msk.f32.vlgmr.msra.gmra.mxu1 %vm311_vm2, %v381_v17  ;;  %v556_v25 = vpop.permute.xlu0 %555  ;;  %v733_v26 = vpop.permute.xlu1 %732 }
 0x25a   :  { %2220 = vmatpush3.xpose.msk.msra.mxu1 %vm311_vm2, %v556_v25  ;;  %2221 = vmatprep.mubr.msk.f32.mxu1 %vm2550_vm1, %v2549_v6 }
 0x25b   :  { %2229 = vmatprep.subr.mxu1 %v2549_v6 }
 0x25d   :  { %2222 = vmatmul.mubr.msk.f32.vlgmr.msra.gmra.mxu1 %vm311_vm2, %v554_v23  ;;  %v731_v27 = vpop.permute.xlu0 %730  ;;  %v909_v28 = vpop.permute.xlu1 %908 }
 0x25e   :  { %2230 = vmatpush3.xpose.msk.msra.mxu1 %vm311_vm2, %v733_v26  ;;  %2231 = vmatprep.mubr.msk.f32.mxu1 %vm2550_vm1, %v2549_v6 }
 0x25f   :  { %2239 = vmatprep.subr.mxu1 %v2549_v6 }
 0x261   :  { %2232 = vmatmul.mubr.msk.f32.vlgmr.msra.gmra.mxu1 %vm311_vm2, %v731_v27  ;;  %v907_v29 = vpop.permute.xlu0 %906 }
 0x262   :  { %2240 = vmatpush3.xpose.msk.msra.mxu1 %vm311_vm2, %v909_v28  ;;  %2241 = vmatprep.mubr.msk.f32.mxu1 %vm2550_vm1, %v2549_v6 }
 0x263   :  { %2249 = vmatprep.subr.mxu1 %v2549_v6 }
 0x265   :  { %2242 = vmatmul.mubr.msk.f32.vlgmr.msra.gmra.mxu1 %vm311_vm2, %v907_v29 }
 0x266   :  { %2250 = vmatpush3.msra.mxu1 %v2665_v9  ;;  %2251 = vmatprep.mubr.msk.f32.mxu1 %vm2550_vm1, %v2549_v6 }
 0x267   :  { %2259 = vmatprep.subr.mxu1 %v2549_v6 }
 0x269   :  { %2252 = vmatmul.mubr.msk.f32.vlgmr.msra.gmra.mxu1 %vm311_vm2, %v2667_v12 }
 0x26a   :  { %2260 = vmatpush3.msra.mxu1 %v2714_v30  ;;  %2261 = vmatprep.mubr.msk.f32.mxu1 %vm2550_vm1, %v2549_v6 }
 0x26b   :  { %2269 = vmatprep.subr.mxu1 %v2549_v6 }
 0x319   :  { %v459_v32 = vpop.f32.mrf.mxu1 }
 0x31a   :  { %v460_v33 = vadd.f32 %v459_v32, %v2722_v31 }
 0x31b   :  { %v2213_v34 = vpop.f32.mrf.mxu1 }
 0x31c   :  { %v463_v36 = vsel %vm311_vm2, %v460_v33, -inf }
 0x31d   :  { %464 = vmax.xlane.f32.xlu1 %v463_v36  ;;  %v627_v37 = vpop.f32.mrf.mxu1 }
 0x31e   :  { %v628_v38 = vadd.f32 %v627_v37, %v2725_v35  ;;  %v1848_v37 = vsel %vm142_vm0, %v2714_v30, 0.0 }
 0x31f   :  { %v2223_v39 = vpop.f32.mrf.mxu1 }
 0x320   :  { %v631_v41 = vsel %vm311_vm2, %v628_v38, -inf }
 0x321   :  { %632 = vmax.xlane.f32.xlu0 %v631_v41  ;;  %v804_v42 = vpop.f32.mrf.mxu1 }
 0x322   :  { %v805_v43 = vadd.f32 %v804_v42, %v2729_v40  ;;  %v1849_v42 = vrot.slane %v1848_v37, 4 }
 0x323   :  { %v2233_v44 = vpop.f32.mrf.mxu1 }
 0x324   :  { %v808_v46 = vsel %vm311_vm2, %v805_v43, -inf }
 0x325   :  { %809 = vmax.xlane.f32.xlu0 %v808_v46  ;;  %v980_v47 = vpop.f32.mrf.mxu1 }
 0x326   :  { %v981_v48 = vadd.f32 %v980_v47, %v2733_v45 }
 0x327   :  { %v2243_v49 = vpop.f32.mrf.mxu1 }
 0x328   :  { %v984_v50 = vsel %vm311_vm2, %v981_v48, -inf }
 0x329   :  { %985 = vmax.xlane.f32.xlu1 %v984_v50  ;;  %v2738_v51 = vpop.f32.mrf.mxu1 }
 0x32b   :  { %v2253_v52 = vpop.f32.mrf.mxu1 }
 0x3a6   :  { %v465_v53 = vpop.xlane.xlu1 %464 }
 0x3a7   :  { %v466_v54 = vsub.f32 %v460_v33, %v465_v53 }
 0x3a9   :  { %v467_v55 = vmul.f32 1.442695, %v466_v54 }
 0x3aa   :  { %v633_v56 = vpop.xlane.xlu0 %632 }
 0x3ab   :  { %2338 = vpow2.f32 %v467_v55  ;;  %v634_v57 = vsub.f32 %v628_v38, %v633_v56  ;;  %v1841_v38 = vsel %vm142_vm0, %v2688_v22, 0.0 }
 0x3ad   :  { %v635_v58 = vmul.f32 1.442695, %v634_v57 }
 0x3ae   :  { %v810_v59 = vpop.xlane.xlu0 %809 }
 0x3af   :  { %2340 = vpow2.f32 %v635_v58  ;;  %v811_v60 = vsub.f32 %v805_v43, %v810_v59  ;;  %v1842_v43 = vrot.slane %v1841_v38, 4 }
 0x3b1   :  { %v812_v61 = vmul.f32 1.442695, %v811_v60  ;;  %v1843_v49 = vadd.f32 %v1842_v43, %v1841_v38  ;;  %v1861_v60 = vld [vmem:[#allocation14 + $0x18] sm:$0xff] }
 0x3b2   :  { %v986_v4 = vpop.xlane.xlu1 %985 }
 0x3b3   :  { %2342 = vpow2.f32 %v812_v61  ;;  %v987_v5 = vsub.f32 %v981_v48, %v986_v4  ;;  %v1850_v48 = vadd.f32 %v1849_v42, %v1848_v37  ;;  %v1844_v52 = vrot.slane %v1843_v49, 2  ;;  %v1858_v4 = vld [vmem:[#allocation14] sm:$0xff] }
 0x3b5   :  { %v988_v7 = vmul.f32 1.442695, %v987_v5  ;;  %v1851_v53 = vrot.slane %v1850_v48, 2  ;;  %v1845_v55 = vadd.f32 %v1844_v52, %v1843_v49 }
 0x3b7   :  { %2344 = vpow2.f32 %v988_v7  ;;  %v1852_v56 = vadd.f32 %v1851_v53, %v1850_v48 }
 0x3b8   :  { %v2339_v62 = vpop.eup %2338 }
 0x3b9   :  { %v469_v63 = vsel %vm311_vm2, %v2339_v62, 0.0  ;;  %v1853_v58 = vrot.slane %v1852_v56, 1 }
 0x3ba   :  { %470 = vadd.xlane.f32.xlu0 %v469_v63 }
 0x3bb   :  { %v1854_v63 = vadd.f32 %v1853_v58, %v1852_v56 }
 0x3bc   :  { %v2341_v0 = vpop.eup %2340 }
 0x3bd   :  { %v637_v1 = vsel %vm311_vm2, %v2341_v0, 0.0 }
 0x3be   :  { %638 = vadd.xlane.f32.xlu1 %v637_v1  ;;  %v1859_v1 = vld [vmem:[#allocation14 + $0x8] sm:$0xff] }
 0x3c0   :  { %v2343_v2 = vpop.eup %2342 }
 0x3c1   :  { %v814_v3 = vsel %vm311_vm2, %v2343_v2, 0.0 }
 0x3c2   :  { %815 = vadd.xlane.f32.xlu0 %v814_v3  ;;  %v1857_v3 = vmul.f32 0.125, %v1854_v63 }
 0x3c4   :  { %v2345_v8 = vpop.eup %2344 }
 0x3c5   :  { %v990_v9 = vsel %vm311_vm2, %v2345_v8, 0.0 }
 0x3cf   :  { %822 = vrot.lane.b32.xlu1 %v2688_v22, %s2556_s30 }
 0x3d8   :  { %646 = vrot.lane.b32.xlu0 %v2688_v22, %s2551_s2 }
 0x3dc   :  { %1152 = vrot.lane.b32.xlu0 %v2738_v51, %s2552_s27 }
 0x3e0   :  { %1317 = vrot.lane.b32.xlu0 %v2738_v51, %s2551_s2 }
 0x3e4   :  { %1492 = vrot.lane.b32.xlu0 %v2738_v51, %s2556_s30 }
 0x3e8   :  { %1666 = vrot.lane.b32.xlu0 %v2738_v51, %s2557_s5 }
 0x3f3   :  { %991 = vadd.xlane.f32.xlu1 %v990_v9 }
 0x404   :  { %998 = vrot.lane.b32.xlu1 %v2688_v22, %s2557_s5 }
 0x408   :  { %1319 = vrot.lane.b32.xlu1 %v2738_v51, %s2554_s29 }
 0x40c   :  { %1494 = vrot.lane.b32.xlu1 %v2738_v51, %s2553_s28 }
 0x410   :  { %1668 = vrot.lane.b32.xlu1 %v2738_v51, %s2555_s1 }
 0x443   :  { %v471_v10 = vpop.xlane.xlu0 %470 }
 0x444   :  { %2346 = vrcp.f32 %v471_v10 }
 0x447   :  { %v639_v11 = vpop.xlane.xlu1 %638 }
 0x448   :  { %2348 = vrcp.f32 %v639_v11 }
 0x44b   :  { %v816_v12 = vpop.xlane.xlu0 %815  ;;  %v823_v28 = vpop.permute.xlu1 %822 }
 0x44c   :  { %2350 = vrcp.f32 %v816_v12 }
 0x44f   :  { %v647_v25 = vpop.permute.xlu0 %646 }
 0x451   :  { %v2347_v13 = vpop.eup %2346 }
 0x452   :  { %v473_v14 = vmul.f32 %v2347_v13, %v471_v10 }
 0x453   :  { %v1153_v46 = vpop.permute.xlu0 %1152 }
 0x454   :  { %v474_v15 = vsub.f32 2.0, %v473_v14 }
 0x455   :  { %v2349_v16 = vpop.eup %2348 }
 0x456   :  { %v475_v17 = vmul.f32 %v2347_v13, %v474_v15  ;;  %v641_v18 = vmul.f32 %v2349_v16, %v639_v11 }
 0x457   :  { %v1318_v22 = vpop.permute.xlu0 %1317 }
 0x458   :  { %v476_v19 = vmul.f32 %v2339_v62, %v475_v17  ;;  %v642_v20 = vsub.f32 2.0, %v641_v18 }
 0x459   :  { %v2351_v21 = vpop.eup %2350 }
 0x45a   :  { %v643_v23 = vmul.f32 %v2349_v16, %v642_v20  ;;  %v818_v24 = vmul.f32 %v2351_v21, %v816_v12  ;;  %2217 = vmatmul.mubr.msk.f32.vlgmr.msra.gmra.mxu0 %vm311_vm2, %v476_v19 }
 0x45b   :  { %2225 = vmatpush3.msra.mxu0 %v647_v25  ;;  %2226 = vmatprep.mubr.msk.f32.mxu0 %vm2550_vm1, %v2549_v6  ;;  %v1493_v57 = vpop.permute.xlu0 %1492 }
 0x45c   :  { %v644_v26 = vmul.f32 %v2341_v0, %v643_v23  ;;  %v819_v27 = vsub.f32 2.0, %v818_v24  ;;  %2234 = vmatprep.subr.mxu0 %v2549_v6  ;;  %v1860_v0 = vld [vmem:[#allocation14 + $0x10] sm:$0xff] }
 0x45e   :  { %v820_v29 = vmul.f32 %v2351_v21, %v819_v27  ;;  %2227 = vmatmul.mubr.msk.f32.vlgmr.msra.gmra.mxu0 %vm311_vm2, %v644_v26 }
 0x45f   :  { %2235 = vmatpush3.msra.mxu0 %v823_v28  ;;  %2236 = vmatprep.mubr.msk.f32.mxu0 %vm2550_vm1, %v2549_v6  ;;  %v1667_v61 = vpop.permute.xlu0 %1666 }
 0x460   :  { %v821_v32 = vmul.f32 %v2343_v2, %v820_v29  ;;  %2244 = vmatprep.subr.mxu0 %v2549_v6 }
 0x462   :  { %2237 = vmatmul.mubr.msk.f32.vlgmr.msra.gmra.mxu0 %vm311_vm2, %v821_v32 }
 0x463   :  { %2246 = vmatprep.mubr.msk.f32.mxu0 %vm2550_vm1, %v2549_v6 }
 0x47c   :  { %v992_v33 = vpop.xlane.xlu1 %991 }
 0x47d   :  { %2352 = vrcp.f32 %v992_v33 }
 0x480   :  { %v999_v34 = vpop.permute.xlu1 %998 }
 0x481   :  { %2245 = vmatpush3.msra.mxu0 %v999_v34 }
 0x482   :  { %2254 = vmatprep.subr.mxu0 %v2549_v6 }
 0x484   :  { %v1320_v50 = vpop.permute.xlu1 %1319 }
 0x488   :  { %v1495_v54 = vpop.permute.xlu1 %1494 }
 0x48a   :  { %v2353_v36 = vpop.eup %2352 }
 0x48b   :  { %v994_v39 = vmul.f32 %v2353_v36, %v992_v33 }
 0x48c   :  { %v1669_v59 = vpop.permute.xlu1 %1668 }
 0x48d   :  { %v995_v41 = vsub.f32 2.0, %v994_v39 }
 0x48f   :  { %v996_v44 = vmul.f32 %v2353_v36, %v995_v41 }
 0x491   :  { %v997_v47 = vmul.f32 %v2345_v8, %v996_v44 }
 0x493   :  { %2247 = vmatmul.mubr.msk.f32.vlgmr.msra.gmra.mxu0 %vm311_vm2, %v997_v47 }
 0x494   :  { %2255 = vmatpush3.xpose.msk.msra.mxu0 %vm311_vm2, %v1153_v46  ;;  %2256 = vmatprep.mubr.msk.f32.mxu0 %vm2550_vm1, %v2549_v6 }
 0x495   :  { %2264 = vmatprep.subr.mxu0 %v2549_v6 }
 0x497   :  { %2257 = vmatmul.mubr.msk.f32.vlgmr.msra.gmra.mxu0 %vm311_vm2, %v2738_v51  ;;  %v1846_v51 = vrot.slane %v1845_v55, 1 }
 0x498   :  { %2265 = vmatpush3.xpose.msk.msra.mxu0 %vm311_vm2, %v1320_v50  ;;  %2266 = vmatprep.mubr.msk.f32.mxu0 %vm2550_vm1, %v2549_v6 }
 0x499   :  { %2274 = vmatprep.subr.mxu0 %v2549_v6  ;;  %v1847_v62 = vadd.f32 %v1846_v51, %v1845_v55 }
 0x49b   :  { %2267 = vmatmul.mubr.msk.f32.vlgmr.msra.gmra.mxu0 %vm311_vm2, %v1318_v22  ;;  %v1856_v2 = vmul.f32 0.125, %v1847_v62 }
 0x49c   :  { %2275 = vmatpush3.xpose.msk.msra.mxu0 %vm311_vm2, %v1495_v54  ;;  %2276 = vmatprep.mubr.msk.f32.mxu0 %vm2550_vm1, %v2549_v6 }
 0x49d   :  { %2284 = vmatprep.subr.mxu0 %v2549_v6  ;;  %v1865_v5 = vsel %vm1864_vm3, %v1857_v3, %v1856_v2 }
 0x49f   :  { %2277 = vmatmul.mubr.msk.f32.vlgmr.msra.gmra.mxu0 %vm311_vm2, %v1493_v57 }
 0x4a0   :  { %2285 = vmatpush3.xpose.msk.msra.mxu0 %vm311_vm2, %v1669_v59  ;;  %2286 = vmatprep.mubr.msk.f32.mxu0 %vm2550_vm1, %v2549_v6 }
 0x4a1   :  { %2294 = vmatprep.subr.mxu0 %v2549_v6 }
 0x4a3   :  { %2287 = vmatmul.mubr.msk.f32.vlgmr.msra.gmra.mxu0 %vm311_vm2, %v1667_v61 }
 0x4a4   :  { %2295 = vmatpush3.msra.mxu0 %v1861_v60  ;;  %2302 = vmatprep.mubr.msk.f32.mxu0 %vm2550_vm1, %v2549_v6 }
 0x4a5   :  { %2296 = vmatprep.subr.mxu0 %v2549_v6 }
 0x4a6   :  { %2297 = vmatpush3.msra.mxu0 %v1860_v0 }
 0x4a7   :  { %2298 = vmatprep.subr.mxu0 %v2549_v6 }
 0x4a8   :  { %2299 = vmatpush3.msra.mxu0 %v1859_v1 }
 0x4a9   :  { %2300 = vmatprep.subr.mxu0 %v2549_v6 }
 0x4aa   :  { %2301 = vmatpush3.msra.mxu0 %v1858_v4 }
 0x4ab   :  { %2303 = vmatmul.mubr.msk.f32.vlgmr.msra.gmra.mxu0 %vm142_vm0, %v1865_v5 }
 0x51a   :  { %v546_v7 = vpop.f32.mrf.mxu0 }
 0x51b   :  { %550 = vst.msk [vmem:[#allocation2] sm:$0xff] %vm311_vm2, %v546_v7 }
 0x51c   :  { %v2218_v8 = vpop.f32.mrf.mxu0 }
 0x51e   :  { %v718_v9 = vpop.f32.mrf.mxu0 }
 0x520   :  { %v2228_v10 = vpop.f32.mrf.mxu0 }
 0x522   :  { %v894_v11 = vpop.f32.mrf.mxu0 }
 0x524   :  { %v2238_v12 = vpop.f32.mrf.mxu0 }
 0x553   :  { %v1070_v13 = vpop.f32.mrf.mxu0 }
 0x555   :  { %v2248_v14 = vpop.f32.mrf.mxu0 }
 0x557   :  { %v1224_v15 = vpop.f32.mrf.mxu0 }
 0x558   :  { %v1225_v16 = vadd.f32 %v1224_v15, %v2722_v31 }
 0x559   :  { %v2258_v17 = vpop.f32.mrf.mxu0 }
 0x55a   :  { %v1228_v18 = vsel %vm311_vm2, %v1225_v16, -inf }
 0x55b   :  { %1229 = vmax.xlane.f32.xlu1 %v1228_v18  ;;  %v1391_v19 = vpop.f32.mrf.mxu0 }
 0x55c   :  { %v1392_v20 = vadd.f32 %v1391_v19, %v2725_v35 }
 0x55d   :  { %v2268_v21 = vpop.f32.mrf.mxu0 }
 0x55e   :  { %v1395_v23 = vsel %vm311_vm2, %v1392_v20, -inf }
 0x55f   :  { %1396 = vmax.xlane.f32.xlu0 %v1395_v23  ;;  %v1566_v24 = vpop.f32.mrf.mxu0 }
 0x560   :  { %v1567_v25 = vadd.f32 %v1566_v24, %v2729_v40 }
 0x561   :  { %v2278_v26 = vpop.f32.mrf.mxu0 }
 0x562   :  { %v1570_v27 = vsel %vm311_vm2, %v1567_v25, -inf }
 0x563   :  { %1571 = vmax.xlane.f32.xlu0 %v1570_v27  ;;  %v1740_v28 = vpop.f32.mrf.mxu0  ;;  %v1941_v27 = vld [vmem:[#allocation12 + $0x18] sm:$0xff] }
 0x564   :  { %v1741_v31 = vadd.f32 %v1740_v28, %v2733_v45  ;;  %v1940_v28 = vld [vmem:[#allocation12 + $0x10] sm:$0xff] }
 0x565   :  { %v2288_v29 = vpop.f32.mrf.mxu0 }
 0x566   :  { %v1744_v32 = vsel %vm311_vm2, %v1741_v31, -inf  ;;  %v1938_v29 = vld [vmem:[#allocation12] sm:$0xff] }
 0x567   :  { %1745 = vmax.xlane.f32.xlu1 %v1744_v32 }
 0x56b   :  { %v2817_v33 = vpop.f32.mrf.mxu0 }
 0x56d   :  { %v2304_v35 = vpop.f32.mrf.mxu0 }
 0x5e4   :  { %v1230_v34 = vpop.xlane.xlu1 %1229 }
 0x5e5   :  { %v1231_v36 = vsub.f32 %v1225_v16, %v1230_v34 }
 0x5e7   :  { %v1232_v37 = vmul.f32 1.442695, %v1231_v36 }
 0x5e8   :  { %v1397_v38 = vpop.xlane.xlu0 %1396 }
 0x5e9   :  { %2354 = vpow2.f32 %v1232_v37  ;;  %v1398_v40 = vsub.f32 %v1392_v20, %v1397_v38 }
 0x5eb   :  { %v1399_v39 = vmul.f32 1.442695, %v1398_v40  ;;  %v2560_v40 = vmov 1966171168  }
 0x5ec   :  { %v1572_v41 = vpop.xlane.xlu0 %1571 }
 0x5ed   :  { %2356 = vpow2.f32 %v1399_v39  ;;  %v1573_v42 = vsub.f32 %v1567_v25, %v1572_v41  ;;  %v2032_v39 = vunpack.c.l.s4 %v2560_v40  ;;  %v2034_v41 = vlaneseq }
 0x5ef   :  { %v1574_v43 = vmul.f32 1.442695, %v1573_v42  ;;  %v2033_v42 = vunpack.c.0.s8 %v2032_v39 }
 0x5f0   :  { %v1746_v50 = vpop.xlane.xlu1 %1745 }
 0x5f1   :  { %2358 = vpow2.f32 %v1574_v43  ;;  %v1747_v22 = vsub.f32 %v1741_v31, %v1746_v50  ;;  %v1939_v31 = vld [vmem:[#allocation12 + $0x8] sm:$0xff]  ;;  %v2035_v43 = vshrl.u32 %v2034_v41, 7 }
 0x5f3   :  { %v1748_v52 = vmul.f32 1.442695, %v1747_v22  ;;  %v2055_v50 = vsub.s32 0, %v2035_v43 }
 0x5f5   :  { %2360 = vpow2.f32 %v1748_v52 }
 0x5f6   :  { %v2355_v45 = vpop.eup %2354 }
 0x5f7   :  { %v1234_v44 = vsel %vm311_vm2, %v2355_v45, 0.0 }
 0x5f8   :  { %1235 = vadd.xlane.f32.xlu0 %v1234_v44 }
 0x5fa   :  { %v2357_v46 = vpop.eup %2356 }
 0x5fb   :  { %v1401_v47 = vsel %vm311_vm2, %v2357_v46, 0.0 }
 0x5fc   :  { %1402 = vadd.xlane.f32.xlu1 %v1401_v47 }
 0x5fe   :  { %v2359_v48 = vpop.eup %2358 }
 0x5ff   :  { %v1576_v49 = vsel %vm311_vm2, %v2359_v48, 0.0 }
 0x600   :  { %1577 = vadd.xlane.f32.xlu0 %v1576_v49 }
 0x602   :  { %v2361_v53 = vpop.eup %2360 }
 0x603   :  { %v1750_v54 = vsel %vm311_vm2, %v2361_v53, 0.0 }
 0x60d   :  { %1584 = vrot.lane.b32.xlu1 %v2714_v30, %s2556_s30 }
 0x616   :  { %1410 = vrot.lane.b32.xlu0 %v2714_v30, %s2551_s2 }
 0x61a   :  { %723 = vrot.lane.b32.xlu0 %v718_v9, %s2543_s19 }
 0x631   :  { %1751 = vadd.xlane.f32.xlu1 %v1750_v54 }
 0x642   :  { %1758 = vrot.lane.b32.xlu1 %v2714_v30, %s2557_s5 }
 0x646   :  { %899 = vrot.lane.b32.xlu1 %v894_v11, %s2558_s4 }
 0x64a   :  { %1075 = vrot.lane.b32.xlu1 %v1070_v13, %s2559_s13 }
 0x681   :  { %v1236_v55 = vpop.xlane.xlu0 %1235 }
 0x682   :  { %2362 = vrcp.f32 %v1236_v55 }
 0x685   :  { %v1403_v56 = vpop.xlane.xlu1 %1402 }
 0x686   :  { %2364 = vrcp.f32 %v1403_v56 }
 0x689   :  { %v1578_v57 = vpop.xlane.xlu0 %1577  ;;  %v1585_v9 = vpop.permute.xlu1 %1584 }
 0x68a   :  { %2366 = vrcp.f32 %v1578_v57 }
 0x68d   :  { %v1411_v51 = vpop.permute.xlu0 %1410 }
 0x68f   :  { %v2363_v58 = vpop.eup %2362 }
 0x690   :  { %v1238_v59 = vmul.f32 %v2363_v58, %v1236_v55 }
 0x691   :  { %v724_v60 = vpop.permute.xlu0 %723 }
 0x692   :  { %v1239_v61 = vsub.f32 2.0, %v1238_v59  ;;  %727 = vst.msk [vmem:[#allocation2] sm:$0xff] %vm726_vm4, %v724_v60 }
 0x693   :  { %v2365_v30 = vpop.eup %2364 }
 0x694   :  { %v1240_v62 = vmul.f32 %v2363_v58, %v1239_v61  ;;  %v1405_v63 = vmul.f32 %v2365_v30, %v1403_v56 }
 0x696   :  { %v1241_v0 = vmul.f32 %v2355_v45, %v1240_v62  ;;  %v1406_v1 = vsub.f32 2.0, %v1405_v63  ;;  %v2036_v45 = vsub.s32 %v2033_v42, %v2035_v43 }
 0x697   :  { %v2367_v2 = vpop.eup %2366 }
 0x698   :  { %v1407_v3 = vmul.f32 %v2365_v30, %v1406_v1  ;;  %v1580_v4 = vmul.f32 %v2367_v2, %v1578_v57  ;;  %2262 = vmatmul.mubr.msk.f32.vlgmr.msra.gmra.mxu1 %vm311_vm2, %v1241_v0  ;;  %v2037_v44 = vrot.slane %v2817_v33, %v2036_v45 }
 0x699   :  { %2270 = vmatpush3.msra.mxu1 %v1411_v51  ;;  %2271 = vmatprep.mubr.msk.f32.mxu1 %vm2550_vm1, %v2549_v6 }
 0x69a   :  { %v1408_v5 = vmul.f32 %v2357_v46, %v1407_v3  ;;  %v1581_v7 = vsub.f32 2.0, %v1580_v4  ;;  %2279 = vmatprep.subr.mxu1 %v2549_v6  ;;  %v2038_v46 = vcombine.high %v2037_v44, %v2037_v44  ;;  %v2045_v49 = vrot.slane %v2037_v44, %v2036_v45 }
 0x69c   :  { %v1582_v8 = vmul.f32 %v2367_v2, %v1581_v7  ;;  %2272 = vmatmul.mubr.msk.f32.vlgmr.msra.gmra.mxu1 %vm311_vm2, %v1408_v5  ;;  %v2052_v47 = vrot.slane %v2038_v46, %v2036_v45  ;;  %v2056_v57 = vrot.slane %v2045_v49, %v2055_v50 }
 0x69d   :  { %2280 = vmatpush3.msra.mxu1 %v1585_v9  ;;  %2281 = vmatprep.mubr.msk.f32.mxu1 %vm2550_vm1, %v2549_v6 }
 0x69e   :  { %v1583_v10 = vmul.f32 %v2359_v48, %v1582_v8  ;;  %2289 = vmatprep.subr.mxu1 %v2549_v6  ;;  %v2120_v48 = vld [vmem:[%s2877_s9] ss:$0 sm:$0xff] }
 0x6a0   :  { %2282 = vmatmul.mubr.msk.f32.vlgmr.msra.gmra.mxu1 %vm311_vm2, %v1583_v10 }
 0x6a1   :  { %2291 = vmatprep.mubr.msk.f32.mxu1 %vm2550_vm1, %v2549_v6 }
 0x6ba   :  { %v1752_v11 = vpop.xlane.xlu1 %1751 }
 0x6bb   :  { %2368 = vrcp.f32 %v1752_v11 }
 0x6be   :  { %v1759_v12 = vpop.permute.xlu1 %1758 }
 0x6bf   :  { %2290 = vmatpush3.msra.mxu1 %v1759_v12 }
 0x6c0   :  { %2305 = vmatprep.subr.mxu1 %v1941_v27 }
 0x6c2   :  { %v900_v13 = vpop.permute.xlu1 %899 }
 0x6c3   :  { %903 = vst.msk [vmem:[#allocation2] sm:$0xff] %vm902_vm5, %v900_v13 }
 0x6c6   :  { %v1076_v14 = vpop.permute.xlu1 %1075 }
 0x6c7   :  { %1079 = vst.msk [vmem:[#allocation2] sm:$0xff] %vm1078_vm6, %v1076_v14 }
 0x6c8   :  { %v2369_v15 = vpop.eup %2368 }
 0x6c9   :  { %v1754_v16 = vmul.f32 %v2369_v15, %v1752_v11 }
 0x6cb   :  { %v1755_v17 = vsub.f32 2.0, %v1754_v16 }
 0x6cd   :  { %v1756_v18 = vmul.f32 %v2369_v15, %v1755_v17 }
 0x6ce   :  { %v1839_v6 = vld [vmem:[#allocation2] sm:$0xff] }
 0x6cf   :  { %v1757_v19 = vmul.f32 %v2361_v53, %v1756_v18  ;;  %v2060_v53 = vrot.slane %v2052_v47, %v2055_v50 }
 0x6d1   :  { %2292 = vmatmul.mubr.msk.f32.vlgmr.msra.gmra.mxu1 %vm311_vm2, %v1757_v19 }
 0x6d2   :  { %2313 = vmatprep.mubr.msk.f32.mxu1 %vm142_vm0, %v1839_v6  ;;  %2306 = vmatpush3.msra.mxu1 %v1941_v27 }
 0x6d3   :  { %2307 = vmatprep.subr.mxu1 %v1940_v28 }
 0x6d4   :  { %2308 = vmatpush3.msra.mxu1 %v1940_v28 }
 0x6d5   :  { %2309 = vmatprep.subr.mxu1 %v1939_v31 }
 0x6d6   :  { %2310 = vmatpush3.msra.mxu1 %v1939_v31 }
 0x6d7   :  { %2311 = vmatprep.subr.mxu1 %v1938_v29 }
 0x6d8   :  { %2312 = vmatpush3.msra.mxu1 %v1938_v29 }
 0x758   :  { %v1311_v20 = vpop.f32.mrf.mxu1 }
 0x759   :  { %1315 = vst.msk [vmem:[#allocation2 + $0x8] sm:$0xff] %vm311_vm2, %v1311_v20 }
 0x75a   :  { %v2263_v21 = vpop.f32.mrf.mxu1 }
 0x75c   :  { %v1482_v23 = vpop.f32.mrf.mxu1 }
 0x75d   :  { %1487 = vrot.lane.b32.xlu0 %v1482_v23, %s2543_s19 }
 0x75e   :  { %v2273_v24 = vpop.f32.mrf.mxu1 }
 0x760   :  { %v1656_v25 = vpop.f32.mrf.mxu1 }
 0x761   :  { %1661 = vrot.lane.b32.xlu0 %v1656_v25, %s2558_s4 }
 0x762   :  { %v2283_v26 = vpop.f32.mrf.mxu1 }
 0x791   :  { %v1830_v32 = vpop.f32.mrf.mxu1 }
 0x792   :  { %1835 = vrot.lane.b32.xlu1 %v1830_v32, %s2559_s13 }
 0x793   :  { %v2293_v35 = vpop.f32.mrf.mxu1 }
 0x7cf   :  { %v1488_v34 = vpop.permute.xlu0 %1487 }
 0x7d0   :  { %1490 = vst.msk [vmem:[#allocation2 + $0x8] sm:$0xff] %vm726_vm4, %v1488_v34 }
 0x7d3   :  { %v1662_v36 = vpop.permute.xlu0 %1661 }
 0x7d4   :  { %1664 = vst.msk [vmem:[#allocation2 + $0x8] sm:$0xff] %vm902_vm5, %v1662_v36 }
 0x804   :  { %v1836_v37 = vpop.permute.xlu1 %1835 }
 0x805   :  { %1838 = vst.msk [vmem:[#allocation2 + $0x8] sm:$0xff] %vm1078_vm6, %v1836_v37 }
 0x80c   :  { %v1840_v38 = vld [vmem:[#allocation2 + $0x8] sm:$0xff] }
 0x80d   :  { %2314 = vmatmul.mubr.msk.f32.vlgmr.msra.gmra.mxu1 %vm142_vm0, %v1840_v38 }
 0x8cd   :  { %v2315_v22 = vpop.f32.mrf.mxu1 }
 0x8ce   :  { %v2027_v52 = vadd.f32 %v2315_v22, %v2120_v48 }
 0x8cf   :  { %v2021_v54 = vpop.f32.mrf.mxu1 }
 0x8d0   :  { %v2064_v55 = vadd.f32 %v2060_v53, %v2027_v52  ;;  %v2022_v56 = vadd.f32 %v2120_v48, %v2021_v54 }
 0x8d2   :  { %2066 = vst.msk [vmem:[#allocation15 + $0x8] sm:$0xff] %vm142_vm0, %v2064_v55  ;;  %v2063_v33 = vadd.f32 %v2056_v57, %v2022_v56 }
 0x8d4   :  { %2065 = vst.msk [vmem:[#allocation15] sm:$0xff] %vm142_vm0, %v2063_v33 }
 0x8d5   :  { %2521 = shalt.err (!%p2518_p11)
}
 0x8d6   :  { %2078 = dma.vmem_to_hbm [thread:$0]  %s2073_s7, 256, %s2878_s10, [#allocation5], %s2542_s18, %s2542_s18, %s2543_s19  }
 0x8d7   :  { %2538 = dma.done.wait [#allocation5], 256  }
 0x8d8   :  { %2539 = vsyncadd [#allocation5], 4294967040 }
 0x8d9   :  { %2082 = vsyncpa [#allocation4], 1 }
 0x8da   :  { %2083 = vsyncpa [#allocation7], 1 }
 0x8db   :  { %2084 = vsyncpa [#allocation10], 1 }
 0x8dc   :  { %2085 = vsyncpa [#allocation13], 1 }
 0x8dd   :  { %2086 = vsyncpa [#allocation5], 1 }

</bundles_post_ra>
